<compile_context>
chip_gen: v5e
topology: v5e:2x2
jax: 0.10.0
libtpu: 0.0.40
codegen_flags: <defaults>
</compile_context>

<pallas_src>
import jax
import jax.numpy as jnp
from jax.experimental import pallas as pl
from jax.experimental.pallas import tpu as pltpu  # noqa: F401  (kept for parity / future tiling)


# ---------------------------------------------------------------------------
# Fused kernel builder
# ---------------------------------------------------------------------------
def make_grunet_kernel(L, S, B, D, H, O):
    """Fused GRUNet forward kernel.

    Positional refs:
      inputs : x_tm (S*B, D) time-major, h0 (L, B, H),
               per layer: wih_all (Din, 3H), whh_all (H, 3H),
                          bi_all (1, 3H)  [= b_ih + (b_hr, b_hz, 0)],
                          bhn    (1, H)   [= b_hn],
               w_fc (H, O), b_fc (1, O)
      outputs: out (B, O), h_out (L, B, H)
    """
    f32 = jnp.float32

    def kernel(*refs):
        it = iter(refs)
        x_ref = next(it)                                     # (S*B, D)
        h0_ref = next(it)                                    # (L, B, H)
        layer_refs = [tuple(next(it) for _ in range(4)) for _ in range(L)]
        wfc_ref = next(it)                                   # (H, O)
        bfc_ref = next(it)                                   # (1, O)
        out_ref = next(it)                                   # (B, O)
        hout_ref = next(it)                                  # (L, B, H)

        # Load (tiny) weights once; they stay vreg/VMEM resident.
        wih = [layer_refs[l][0][...] for l in range(L)]      # (Din, 3H)
        whh = [layer_refs[l][1][...] for l in range(L)]      # (H, 3H)
        bi = [layer_refs[l][2][...] for l in range(L)]       # (1, 3H)
        bhn = [layer_refs[l][3][...] for l in range(L)]      # (1, H)

        # Hoist the per-step (1,H)->(B,H) / (1,3H)->(B,3H) broadcasts out of
        # the unrolled loops (broadcast_in_dim is not CSE'd across steps).
        bhn_b = [jnp.broadcast_to(bhn[l], (B, H)) for l in range(L)]
        bi_b = [None] + [jnp.broadcast_to(bi[l], (B, 3 * H)) for l in range(1, L)]

        # Hoisted layer-0 input projection: one (S*B, D) @ (D, 3H) matmul,
        # input-side + folded recurrent (r, z) biases added once.
        gi0 = jnp.dot(x_ref[...], wih[0], preferred_element_type=f32) + bi[0]   # (S*B, 3H)

        def gru_step(h_prev, gi, whh_l, bhn_l):
            # One fused recurrent matmul per step (3 gates along the lane axis).
            gh = jnp.dot(h_prev, whh_l, preferred_element_type=f32)             # (B, 3H)
            r = jax.nn.sigmoid(gi[:, 0:H] + gh[:, 0:H])
            z = jax.nn.sigmoid(gi[:, H:2 * H] + gh[:, H:2 * H])
            n = jnp.tanh(gi[:, 2 * H:3 * H] + r * (gh[:, 2 * H:3 * H] + bhn_l))
            return (1.0 - z) * n + z * h_prev

        h = [h0_ref[l] for l in range(L)]                    # current hidden per layer, (B, H)
        gi_next = [None] * L                                 # pending input projection per layer

        # Wavefront over (layer, time): wave w runs layer l at t = w - l.
        # Higher layers first within a wave so they consume gi_next before the
        # lower layer overwrites it with the projection for the next time step.
        for w in range(S + L - 1):
            l_hi = min(L - 1, w)
            l_lo = max(0, w - S + 1)
            for l in range(l_hi, l_lo - 1, -1):
                t = w - l
                gi = gi0[t * B:(t + 1) * B, :] if l == 0 else gi_next[l]
                h[l] = gru_step(h[l], gi, whh[l], bhn_b[l])
                if l + 1 < L:
                    # Per-step projection for the next layer; depends only on
                    # this wave's h[l], keeping the layers wavefront-parallel.
                    gi_next[l + 1] = (
                        jnp.dot(h[l], wih[l + 1], preferred_element_type=f32)
                        + bi_b[l + 1])

        # TODO(synk): nn.GRU inter-layer dropout (p=0.2) omitted -- identity in eval mode.

        for l in range(L):
            hout_ref[l] = h[l].astype(hout_ref.dtype)

        # Head: out = relu(gru_out[:, -1]) @ W_fc^T + b_fc; gru_out[:, -1] of the
        # top layer is exactly its final hidden state h[L-1].
        y = jnp.dot(jnp.maximum(h[L - 1], 0.0), wfc_ref[...],
                    preferred_element_type=f32) + bfc_ref[...]
        out_ref[...] = y.astype(out_ref.dtype)

    return kernel


# ---------------------------------------------------------------------------
# Wrapper
# ---------------------------------------------------------------------------
def _prep_layer_params(wih, whh, bih, bhh, H):
    """PyTorch-layout GRU layer params -> fused kernel params.

    wih (3H, Din), whh (3H, H), bih (3H,), bhh (3H,), gate order r, z, n.
    Returns wih_all (Din, 3H), whh_all (H, 3H),
            bi_all (1, 3H) = b_ih + (b_hr, b_hz, 0), bhn (1, H).
    """
    wih_all = wih.T.astype(jnp.float32)
    whh_all = whh.T.astype(jnp.float32)
    bi_all = (bih + jnp.concatenate([bhh[:2 * H], jnp.zeros((H,), bhh.dtype)]))
    bi_all = bi_all[None, :].astype(jnp.float32)
    bhn = bhh[2 * H:3 * H][None, :].astype(jnp.float32)
    return wih_all, whh_all, bi_all, bhn


def gru_net_forward(x, h0, gru_params, fc_params):
    """x: (B, S, D) batch_first, h0: (L, B, H). Returns (out, h_out)."""
    B, S, D = x.shape
    L, _, H = h0.shape
    w_fc, b_fc = fc_params                       # PyTorch layout: (O, H), (O,)
    O = w_fc.shape[0]

    # One-time layout plumbing: time-major rows (row = t*B + b) so every
    # per-step slice inside the kernel is a contiguous static sublane slice.
    x_tm = jnp.transpose(x.astype(jnp.float32), (1, 0, 2)).reshape(S * B, D)

    inputs = [x_tm, h0.astype(jnp.float32)]
    for (wih, whh, bih, bhh) in gru_params:
        inputs.extend(_prep_layer_params(wih, whh, bih, bhh, H))
    inputs.extend([w_fc.T.astype(jnp.float32), b_fc[None, :].astype(jnp.float32)])

    kernel = make_grunet_kernel(L, S, B, D, H, O)
    out, h_out = pl.pallas_call(
        kernel,
        out_shape=(jax.ShapeDtypeStruct((B, O), jnp.float32),
                   jax.ShapeDtypeStruct((L, B, H), jnp.float32)),
    )(*inputs)
    return out, h_out


# ---------------------------------------------------------------------------
# Parameter init (PyTorch layout, uniform(-1/sqrt(H), 1/sqrt(H)))
# ---------------------------------------------------------------------------
def init_params(key, input_dim, hidden_dim, output_dim, n_layers):
    k = 1.0 / float(hidden_dim) ** 0.5
    H = hidden_dim
    gru_params = []
    for layer in range(n_layers):
        in_d = input_dim if layer == 0 else hidden_dim
        key, k1, k2, k3, k4 = jax.random.split(key, 5)
        wih = jax.random.uniform(k1, (3 * H, in_d), minval=-k, maxval=k, dtype=jnp.float32)
        whh = jax.random.uniform(k2, (3 * H, H), minval=-k, maxval=k, dtype=jnp.float32)
        bih = jax.random.uniform(k3, (3 * H,), minval=-k, maxval=k, dtype=jnp.float32)
        bhh = jax.random.uniform(k4, (3 * H,), minval=-k, maxval=k, dtype=jnp.float32)
        gru_params.append((wih, whh, bih, bhh))
    key, kf1, kf2 = jax.random.split(key, 3)
    w_fc = jax.random.uniform(kf1, (output_dim, H), minval=-k, maxval=k, dtype=jnp.float32)
    b_fc = jax.random.uniform(kf2, (output_dim,), minval=-k, maxval=k, dtype=jnp.float32)
    return gru_params, (w_fc, b_fc)


# ---------------------------------------------------------------------------
# Pure-JAX reference (textbook per-gate math on the raw PyTorch-layout params)
# ---------------------------------------------------------------------------
def gru_net_reference(x, h0, gru_params, fc_params):
    B, S, _ = x.shape
    H = h0.shape[-1]
    layer_in = x
    h_finals = []
    for layer, (wih, whh, bih, bhh) in enumerate(gru_params):
        w_ir, w_iz, w_in = wih[:H], wih[H:2 * H], wih[2 * H:]
        w_hr, w_hz, w_hn = whh[:H], whh[H:2 * H], whh[2 * H:]
        b_ir, b_iz, b_in = bih[:H], bih[H:2 * H], bih[2 * H:]
        b_hr, b_hz, b_hn = bhh[:H], bhh[H:2 * H], bhh[2 * H:]
        h = h0[layer]
        outs = []
        for t in range(S):
            xt = layer_in[:, t, :]
            r = jax.nn.sigmoid(xt @ w_ir.T + b_ir + h @ w_hr.T + b_hr)
            z = jax.nn.sigmoid(xt @ w_iz.T + b_iz + h @ w_hz.T + b_hz)
            n = jnp.tanh(xt @ w_in.T + b_in + r * (h @ w_hn.T + b_hn))
            h = (1.0 - z) * n + z * h
            outs.append(h)
        layer_in = jnp.stack(outs, axis=1)
        h_finals.append(h)
    w_fc, b_fc = fc_params
    out = jnp.maximum(layer_in[:, -1, :], 0.0) @ w_fc.T + b_fc
    return out, jnp.stack(h_finals, axis=0)


if __name__ == "__main__":
    # Shapes consistent with GRUNet(input_dim, hidden_dim, output_dim, n_layers)
    batch, seq = 2, 8
    input_dim, hidden_dim, output_dim, n_layers = 4, 32, 8, 2

    key = jax.random.PRNGKey(0)
    key, kx = jax.random.split(key)
    x = jax.random.normal(kx, (batch, seq, input_dim), dtype=jnp.float32)
    h0 = jnp.zeros((n_layers, batch, hidden_dim), dtype=jnp.float32)  # init_hidden

    gru_params, fc_params = init_params(key, input_dim, hidden_dim,
                                        output_dim, n_layers)

    out, h_out = gru_net_forward(x, h0, gru_params, fc_params)
    out = jax.block_until_ready(out)
    h_out = jax.block_until_ready(h_out)

    assert out.shape == (batch, output_dim)
    assert h_out.shape == (n_layers, batch, hidden_dim)
    assert jnp.all(jnp.isfinite(out)) and jnp.all(jnp.isfinite(h_out))

    out_ref, h_ref = gru_net_reference(x, h0, gru_params, fc_params)
    assert jnp.allclose(out, out_ref, atol=5e-3, rtol=5e-3), (
        f"out mismatch, max abs err {jnp.max(jnp.abs(out - out_ref))}")
    assert jnp.allclose(h_out, h_ref, atol=5e-3, rtol=5e-3), (
        f"h mismatch, max abs err {jnp.max(jnp.abs(h_out - h_ref))}")

    print("KERNEL_OK")
</pallas_src>

<mosaic_0001>
module attributes {stable_mosaic.version = 11 : i64} {
  func.func @kernel(%arg0: memref<16x4xf32, #tpu.memory_space<vmem>>, %arg1: memref<2x2x32xf32, #tpu.memory_space<vmem>>, %arg2: memref<4x96xf32, #tpu.memory_space<vmem>>, %arg3: memref<32x96xf32, #tpu.memory_space<vmem>>, %arg4: memref<1x96xf32, #tpu.memory_space<vmem>>, %arg5: memref<1x32xf32, #tpu.memory_space<vmem>>, %arg6: memref<32x96xf32, #tpu.memory_space<vmem>>, %arg7: memref<32x96xf32, #tpu.memory_space<vmem>>, %arg8: memref<1x96xf32, #tpu.memory_space<vmem>>, %arg9: memref<1x32xf32, #tpu.memory_space<vmem>>, %arg10: memref<32x8xf32, #tpu.memory_space<vmem>>, %arg11: memref<1x8xf32, #tpu.memory_space<vmem>>, %arg12: memref<2x8xf32, #tpu.memory_space<vmem>>, %arg13: memref<2x2x32xf32, #tpu.memory_space<vmem>>) attributes {dimension_semantics = [], scalar_prefetch = 0 : i64, scratch_operands = 0 : i64, tpu.core_type = #tpu.core_type<tc>} {
    %c0 = arith.constant 0 : index
    %c0_0 = arith.constant 0 : index
    %0 = vector.load %arg2[%c0, %c0_0] : memref<4x96xf32, #tpu.memory_space<vmem>>, vector<4x96xf32>
    %c0_1 = arith.constant 0 : index
    %c0_2 = arith.constant 0 : index
    %1 = vector.load %arg6[%c0_1, %c0_2] : memref<32x96xf32, #tpu.memory_space<vmem>>, vector<32x96xf32>
    %c0_3 = arith.constant 0 : index
    %c0_4 = arith.constant 0 : index
    %2 = vector.load %arg3[%c0_3, %c0_4] : memref<32x96xf32, #tpu.memory_space<vmem>>, vector<32x96xf32>
    %c0_5 = arith.constant 0 : index
    %c0_6 = arith.constant 0 : index
    %3 = vector.load %arg7[%c0_5, %c0_6] : memref<32x96xf32, #tpu.memory_space<vmem>>, vector<32x96xf32>
    %c0_7 = arith.constant 0 : index
    %c0_8 = arith.constant 0 : index
    %4 = vector.load %arg4[%c0_7, %c0_8] : memref<1x96xf32, #tpu.memory_space<vmem>>, vector<1x96xf32>
    %c0_9 = arith.constant 0 : index
    %c0_10 = arith.constant 0 : index
    %5 = vector.load %arg8[%c0_9, %c0_10] : memref<1x96xf32, #tpu.memory_space<vmem>>, vector<1x96xf32>
    %c0_11 = arith.constant 0 : index
    %c0_12 = arith.constant 0 : index
    %6 = vector.load %arg5[%c0_11, %c0_12] : memref<1x32xf32, #tpu.memory_space<vmem>>, vector<1x32xf32>
    %c0_13 = arith.constant 0 : index
    %c0_14 = arith.constant 0 : index
    %7 = vector.load %arg9[%c0_13, %c0_14] : memref<1x32xf32, #tpu.memory_space<vmem>>, vector<1x32xf32>
    %8 = vector.shape_cast %6 : vector<1x32xf32> to vector<1x32xf32>
    %9 = vector.broadcast %8 : vector<1x32xf32> to vector<2x32xf32>
    %10 = vector.shape_cast %7 : vector<1x32xf32> to vector<1x32xf32>
    %11 = vector.broadcast %10 : vector<1x32xf32> to vector<2x32xf32>
    %12 = vector.shape_cast %5 : vector<1x96xf32> to vector<1x96xf32>
    %13 = vector.broadcast %12 : vector<1x96xf32> to vector<2x96xf32>
    %c0_15 = arith.constant 0 : index
    %c0_16 = arith.constant 0 : index
    %14 = vector.load %arg0[%c0_15, %c0_16] : memref<16x4xf32, #tpu.memory_space<vmem>>, vector<16x4xf32>
    %cst = arith.constant dense<0.000000e+00> : vector<16x96xf32>
    %15 = tpu.matmul %14, %0, %cst {dimension_numbers = #tpu.dot_dimension_numbers<[1], [0], [0], [1], [0, 0, 1, 1], [], []>} : vector<16x4xf32>, vector<4x96xf32>, vector<16x96xf32> -> vector<16x96xf32>
    %16 = vector.broadcast %4 : vector<1x96xf32> to vector<16x96xf32>
    %17 = arith.addf %15, %16 : vector<16x96xf32>
    %c0_17 = arith.constant 0 : index
    %c0_18 = arith.constant 0 : index
    %c0_19 = arith.constant 0 : index
    %18 = vector.load %arg1[%c0_17, %c0_18, %c0_19] : memref<2x2x32xf32, #tpu.memory_space<vmem>>, vector<1x2x32xf32>
    %19 = vector.shape_cast %18 : vector<1x2x32xf32> to vector<2x32xf32>
    %c1 = arith.constant 1 : index
    %c0_20 = arith.constant 0 : index
    %c0_21 = arith.constant 0 : index
    %20 = vector.load %arg1[%c1, %c0_20, %c0_21] : memref<2x2x32xf32, #tpu.memory_space<vmem>>, vector<1x2x32xf32>
    %21 = vector.shape_cast %20 : vector<1x2x32xf32> to vector<2x32xf32>
    %22 = vector.extract_strided_slice %17 {offsets = [0, 0], sizes = [2, 96], strides = [1, 1]} : vector<16x96xf32> to vector<2x96xf32>
    %cst_22 = arith.constant dense<0.000000e+00> : vector<2x96xf32>
    %23 = tpu.matmul %19, %2, %cst_22 {dimension_numbers = #tpu.dot_dimension_numbers<[1], [0], [0], [1], [0, 0, 1, 1], [], []>} : vector<2x32xf32>, vector<32x96xf32>, vector<2x96xf32> -> vector<2x96xf32>
    %24 = vector.extract_strided_slice %22 {offsets = [0, 0], sizes = [2, 32], strides = [1, 1]} : vector<2x96xf32> to vector<2x32xf32>
    %25 = vector.extract_strided_slice %23 {offsets = [0, 0], sizes = [2, 32], strides = [1, 1]} : vector<2x96xf32> to vector<2x32xf32>
    %26 = arith.addf %24, %25 : vector<2x32xf32>
    %27 = arith.negf %26 : vector<2x32xf32>
    %28 = math.exp %27 : vector<2x32xf32>
    %cst_23 = arith.constant 1.000000e+00 : f32
    %29 = vector.broadcast %cst_23 : f32 to vector<2x32xf32>
    %30 = arith.addf %29, %28 : vector<2x32xf32>
    %31 = arith.divf %29, %30 : vector<2x32xf32>
    %32 = vector.extract_strided_slice %22 {offsets = [0, 32], sizes = [2, 32], strides = [1, 1]} : vector<2x96xf32> to vector<2x32xf32>
    %33 = vector.extract_strided_slice %23 {offsets = [0, 32], sizes = [2, 32], strides = [1, 1]} : vector<2x96xf32> to vector<2x32xf32>
    %34 = arith.addf %32, %33 : vector<2x32xf32>
    %35 = arith.negf %34 : vector<2x32xf32>
    %36 = math.exp %35 : vector<2x32xf32>
    %cst_24 = arith.constant 1.000000e+00 : f32
    %37 = vector.broadcast %cst_24 : f32 to vector<2x32xf32>
    %38 = arith.addf %37, %36 : vector<2x32xf32>
    %39 = arith.divf %37, %38 : vector<2x32xf32>
    %40 = vector.extract_strided_slice %22 {offsets = [0, 64], sizes = [2, 32], strides = [1, 1]} : vector<2x96xf32> to vector<2x32xf32>
    %41 = vector.extract_strided_slice %23 {offsets = [0, 64], sizes = [2, 32], strides = [1, 1]} : vector<2x96xf32> to vector<2x32xf32>
    %42 = arith.addf %41, %9 : vector<2x32xf32>
    %43 = arith.mulf %31, %42 : vector<2x32xf32>
    %44 = arith.addf %40, %43 : vector<2x32xf32>
    %45 = math.tanh %44 : vector<2x32xf32>
    %cst_25 = arith.constant 1.000000e+00 : f32
    %46 = vector.broadcast %cst_25 : f32 to vector<2x32xf32>
    %47 = arith.subf %46, %39 : vector<2x32xf32>
    %48 = arith.mulf %47, %45 : vector<2x32xf32>
    %49 = arith.mulf %39, %19 : vector<2x32xf32>
    %50 = arith.addf %48, %49 : vector<2x32xf32>
    %cst_26 = arith.constant dense<0.000000e+00> : vector<2x96xf32>
    %51 = tpu.matmul %50, %1, %cst_26 {dimension_numbers = #tpu.dot_dimension_numbers<[1], [0], [0], [1], [0, 0, 1, 1], [], []>} : vector<2x32xf32>, vector<32x96xf32>, vector<2x96xf32> -> vector<2x96xf32>
    %52 = arith.addf %51, %13 : vector<2x96xf32>
    %cst_27 = arith.constant dense<0.000000e+00> : vector<2x96xf32>
    %53 = tpu.matmul %21, %3, %cst_27 {dimension_numbers = #tpu.dot_dimension_numbers<[1], [0], [0], [1], [0, 0, 1, 1], [], []>} : vector<2x32xf32>, vector<32x96xf32>, vector<2x96xf32> -> vector<2x96xf32>
    %54 = vector.extract_strided_slice %52 {offsets = [0, 0], sizes = [2, 32], strides = [1, 1]} : vector<2x96xf32> to vector<2x32xf32>
    %55 = vector.extract_strided_slice %53 {offsets = [0, 0], sizes = [2, 32], strides = [1, 1]} : vector<2x96xf32> to vector<2x32xf32>
    %56 = arith.addf %54, %55 : vector<2x32xf32>
    %57 = arith.negf %56 : vector<2x32xf32>
    %58 = math.exp %57 : vector<2x32xf32>
    %cst_28 = arith.constant 1.000000e+00 : f32
    %59 = vector.broadcast %cst_28 : f32 to vector<2x32xf32>
    %60 = arith.addf %59, %58 : vector<2x32xf32>
    %61 = arith.divf %59, %60 : vector<2x32xf32>
    %62 = vector.extract_strided_slice %52 {offsets = [0, 32], sizes = [2, 32], strides = [1, 1]} : vector<2x96xf32> to vector<2x32xf32>
    %63 = vector.extract_strided_slice %53 {offsets = [0, 32], sizes = [2, 32], strides = [1, 1]} : vector<2x96xf32> to vector<2x32xf32>
    %64 = arith.addf %62, %63 : vector<2x32xf32>
    %65 = arith.negf %64 : vector<2x32xf32>
    %66 = math.exp %65 : vector<2x32xf32>
    %cst_29 = arith.constant 1.000000e+00 : f32
    %67 = vector.broadcast %cst_29 : f32 to vector<2x32xf32>
    %68 = arith.addf %67, %66 : vector<2x32xf32>
    %69 = arith.divf %67, %68 : vector<2x32xf32>
    %70 = vector.extract_strided_slice %52 {offsets = [0, 64], sizes = [2, 32], strides = [1, 1]} : vector<2x96xf32> to vector<2x32xf32>
    %71 = vector.extract_strided_slice %53 {offsets = [0, 64], sizes = [2, 32], strides = [1, 1]} : vector<2x96xf32> to vector<2x32xf32>
    %72 = arith.addf %71, %11 : vector<2x32xf32>
    %73 = arith.mulf %61, %72 : vector<2x32xf32>
    %74 = arith.addf %70, %73 : vector<2x32xf32>
    %75 = math.tanh %74 : vector<2x32xf32>
    %cst_30 = arith.constant 1.000000e+00 : f32
    %76 = vector.broadcast %cst_30 : f32 to vector<2x32xf32>
    %77 = arith.subf %76, %69 : vector<2x32xf32>
    %78 = arith.mulf %77, %75 : vector<2x32xf32>
    %79 = arith.mulf %69, %21 : vector<2x32xf32>
    %80 = arith.addf %78, %79 : vector<2x32xf32>
    %81 = vector.extract_strided_slice %17 {offsets = [2, 0], sizes = [2, 96], strides = [1, 1]} : vector<16x96xf32> to vector<2x96xf32>
    %cst_31 = arith.constant dense<0.000000e+00> : vector<2x96xf32>
    %82 = tpu.matmul %50, %2, %cst_31 {dimension_numbers = #tpu.dot_dimension_numbers<[1], [0], [0], [1], [0, 0, 1, 1], [], []>} : vector<2x32xf32>, vector<32x96xf32>, vector<2x96xf32> -> vector<2x96xf32>
    %83 = vector.extract_strided_slice %81 {offsets = [0, 0], sizes = [2, 32], strides = [1, 1]} : vector<2x96xf32> to vector<2x32xf32>
    %84 = vector.extract_strided_slice %82 {offsets = [0, 0], sizes = [2, 32], strides = [1, 1]} : vector<2x96xf32> to vector<2x32xf32>
    %85 = arith.addf %83, %84 : vector<2x32xf32>
    %86 = arith.negf %85 : vector<2x32xf32>
    %87 = math.exp %86 : vector<2x32xf32>
    %cst_32 = arith.constant 1.000000e+00 : f32
    %88 = vector.broadcast %cst_32 : f32 to vector<2x32xf32>
    %89 = arith.addf %88, %87 : vector<2x32xf32>
    %90 = arith.divf %88, %89 : vector<2x32xf32>
    %91 = vector.extract_strided_slice %81 {offsets = [0, 32], sizes = [2, 32], strides = [1, 1]} : vector<2x96xf32> to vector<2x32xf32>
    %92 = vector.extract_strided_slice %82 {offsets = [0, 32], sizes = [2, 32], strides = [1, 1]} : vector<2x96xf32> to vector<2x32xf32>
    %93 = arith.addf %91, %92 : vector<2x32xf32>
    %94 = arith.negf %93 : vector<2x32xf32>
    %95 = math.exp %94 : vector<2x32xf32>
    %cst_33 = arith.constant 1.000000e+00 : f32
    %96 = vector.broadcast %cst_33 : f32 to vector<2x32xf32>
    %97 = arith.addf %96, %95 : vector<2x32xf32>
    %98 = arith.divf %96, %97 : vector<2x32xf32>
    %99 = vector.extract_strided_slice %81 {offsets = [0, 64], sizes = [2, 32], strides = [1, 1]} : vector<2x96xf32> to vector<2x32xf32>
    %100 = vector.extract_strided_slice %82 {offsets = [0, 64], sizes = [2, 32], strides = [1, 1]} : vector<2x96xf32> to vector<2x32xf32>
    %101 = arith.addf %100, %9 : vector<2x32xf32>
    %102 = arith.mulf %90, %101 : vector<2x32xf32>
    %103 = arith.addf %99, %102 : vector<2x32xf32>
    %104 = math.tanh %103 : vector<2x32xf32>
    %cst_34 = arith.constant 1.000000e+00 : f32
    %105 = vector.broadcast %cst_34 : f32 to vector<2x32xf32>
    %106 = arith.subf %105, %98 : vector<2x32xf32>
    %107 = arith.mulf %106, %104 : vector<2x32xf32>
    %108 = arith.mulf %98, %50 : vector<2x32xf32>
    %109 = arith.addf %107, %108 : vector<2x32xf32>
    %cst_35 = arith.constant dense<0.000000e+00> : vector<2x96xf32>
    %110 = tpu.matmul %109, %1, %cst_35 {dimension_numbers = #tpu.dot_dimension_numbers<[1], [0], [0], [1], [0, 0, 1, 1], [], []>} : vector<2x32xf32>, vector<32x96xf32>, vector<2x96xf32> -> vector<2x96xf32>
    %111 = arith.addf %110, %13 : vector<2x96xf32>
    %cst_36 = arith.constant dense<0.000000e+00> : vector<2x96xf32>
    %112 = tpu.matmul %80, %3, %cst_36 {dimension_numbers = #tpu.dot_dimension_numbers<[1], [0], [0], [1], [0, 0, 1, 1], [], []>} : vector<2x32xf32>, vector<32x96xf32>, vector<2x96xf32> -> vector<2x96xf32>
    %113 = vector.extract_strided_slice %111 {offsets = [0, 0], sizes = [2, 32], strides = [1, 1]} : vector<2x96xf32> to vector<2x32xf32>
    %114 = vector.extract_strided_slice %112 {offsets = [0, 0], sizes = [2, 32], strides = [1, 1]} : vector<2x96xf32> to vector<2x32xf32>
    %115 = arith.addf %113, %114 : vector<2x32xf32>
    %116 = arith.negf %115 : vector<2x32xf32>
    %117 = math.exp %116 : vector<2x32xf32>
    %cst_37 = arith.constant 1.000000e+00 : f32
    %118 = vector.broadcast %cst_37 : f32 to vector<2x32xf32>
    %119 = arith.addf %118, %117 : vector<2x32xf32>
    %120 = arith.divf %118, %119 : vector<2x32xf32>
    %121 = vector.extract_strided_slice %111 {offsets = [0, 32], sizes = [2, 32], strides = [1, 1]} : vector<2x96xf32> to vector<2x32xf32>
    %122 = vector.extract_strided_slice %112 {offsets = [0, 32], sizes = [2, 32], strides = [1, 1]} : vector<2x96xf32> to vector<2x32xf32>
    %123 = arith.addf %121, %122 : vector<2x32xf32>
    %124 = arith.negf %123 : vector<2x32xf32>
    %125 = math.exp %124 : vector<2x32xf32>
    %cst_38 = arith.constant 1.000000e+00 : f32
    %126 = vector.broadcast %cst_38 : f32 to vector<2x32xf32>
    %127 = arith.addf %126, %125 : vector<2x32xf32>
    %128 = arith.divf %126, %127 : vector<2x32xf32>
    %129 = vector.extract_strided_slice %111 {offsets = [0, 64], sizes = [2, 32], strides = [1, 1]} : vector<2x96xf32> to vector<2x32xf32>
    %130 = vector.extract_strided_slice %112 {offsets = [0, 64], sizes = [2, 32], strides = [1, 1]} : vector<2x96xf32> to vector<2x32xf32>
    %131 = arith.addf %130, %11 : vector<2x32xf32>
    %132 = arith.mulf %120, %131 : vector<2x32xf32>
    %133 = arith.addf %129, %132 : vector<2x32xf32>
    %134 = math.tanh %133 : vector<2x32xf32>
    %cst_39 = arith.constant 1.000000e+00 : f32
    %135 = vector.broadcast %cst_39 : f32 to vector<2x32xf32>
    %136 = arith.subf %135, %128 : vector<2x32xf32>
    %137 = arith.mulf %136, %134 : vector<2x32xf32>
    %138 = arith.mulf %128, %80 : vector<2x32xf32>
    %139 = arith.addf %137, %138 : vector<2x32xf32>
    %140 = vector.extract_strided_slice %17 {offsets = [4, 0], sizes = [2, 96], strides = [1, 1]} : vector<16x96xf32> to vector<2x96xf32>
    %cst_40 = arith.constant dense<0.000000e+00> : vector<2x96xf32>
    %141 = tpu.matmul %109, %2, %cst_40 {dimension_numbers = #tpu.dot_dimension_numbers<[1], [0], [0], [1], [0, 0, 1, 1], [], []>} : vector<2x32xf32>, vector<32x96xf32>, vector<2x96xf32> -> vector<2x96xf32>
    %142 = vector.extract_strided_slice %140 {offsets = [0, 0], sizes = [2, 32], strides = [1, 1]} : vector<2x96xf32> to vector<2x32xf32>
    %143 = vector.extract_strided_slice %141 {offsets = [0, 0], sizes = [2, 32], strides = [1, 1]} : vector<2x96xf32> to vector<2x32xf32>
    %144 = arith.addf %142, %143 : vector<2x32xf32>
    %145 = arith.negf %144 : vector<2x32xf32>
    %146 = math.exp %145 : vector<2x32xf32>
    %cst_41 = arith.constant 1.000000e+00 : f32
    %147 = vector.broadcast %cst_41 : f32 to vector<2x32xf32>
    %148 = arith.addf %147, %146 : vector<2x32xf32>
    %149 = arith.divf %147, %148 : vector<2x32xf32>
    %150 = vector.extract_strided_slice %140 {offsets = [0, 32], sizes = [2, 32], strides = [1, 1]} : vector<2x96xf32> to vector<2x32xf32>
    %151 = vector.extract_strided_slice %141 {offsets = [0, 32], sizes = [2, 32], strides = [1, 1]} : vector<2x96xf32> to vector<2x32xf32>
    %152 = arith.addf %150, %151 : vector<2x32xf32>
    %153 = arith.negf %152 : vector<2x32xf32>
    %154 = math.exp %153 : vector<2x32xf32>
    %cst_42 = arith.constant 1.000000e+00 : f32
    %155 = vector.broadcast %cst_42 : f32 to vector<2x32xf32>
    %156 = arith.addf %155, %154 : vector<2x32xf32>
    %157 = arith.divf %155, %156 : vector<2x32xf32>
    %158 = vector.extract_strided_slice %140 {offsets = [0, 64], sizes = [2, 32], strides = [1, 1]} : vector<2x96xf32> to vector<2x32xf32>
    %159 = vector.extract_strided_slice %141 {offsets = [0, 64], sizes = [2, 32], strides = [1, 1]} : vector<2x96xf32> to vector<2x32xf32>
    %160 = arith.addf %159, %9 : vector<2x32xf32>
    %161 = arith.mulf %149, %160 : vector<2x32xf32>
    %162 = arith.addf %158, %161 : vector<2x32xf32>
    %163 = math.tanh %162 : vector<2x32xf32>
    %cst_43 = arith.constant 1.000000e+00 : f32
    %164 = vector.broadcast %cst_43 : f32 to vector<2x32xf32>
    %165 = arith.subf %164, %157 : vector<2x32xf32>
    %166 = arith.mulf %165, %163 : vector<2x32xf32>
    %167 = arith.mulf %157, %109 : vector<2x32xf32>
    %168 = arith.addf %166, %167 : vector<2x32xf32>
    %cst_44 = arith.constant dense<0.000000e+00> : vector<2x96xf32>
    %169 = tpu.matmul %168, %1, %cst_44 {dimension_numbers = #tpu.dot_dimension_numbers<[1], [0], [0], [1], [0, 0, 1, 1], [], []>} : vector<2x32xf32>, vector<32x96xf32>, vector<2x96xf32> -> vector<2x96xf32>
    %170 = arith.addf %169, %13 : vector<2x96xf32>
    %cst_45 = arith.constant dense<0.000000e+00> : vector<2x96xf32>
    %171 = tpu.matmul %139, %3, %cst_45 {dimension_numbers = #tpu.dot_dimension_numbers<[1], [0], [0], [1], [0, 0, 1, 1], [], []>} : vector<2x32xf32>, vector<32x96xf32>, vector<2x96xf32> -> vector<2x96xf32>
    %172 = vector.extract_strided_slice %170 {offsets = [0, 0], sizes = [2, 32], strides = [1, 1]} : vector<2x96xf32> to vector<2x32xf32>
    %173 = vector.extract_strided_slice %171 {offsets = [0, 0], sizes = [2, 32], strides = [1, 1]} : vector<2x96xf32> to vector<2x32xf32>
    %174 = arith.addf %172, %173 : vector<2x32xf32>
    %175 = arith.negf %174 : vector<2x32xf32>
    %176 = math.exp %175 : vector<2x32xf32>
    %cst_46 = arith.constant 1.000000e+00 : f32
    %177 = vector.broadcast %cst_46 : f32 to vector<2x32xf32>
    %178 = arith.addf %177, %176 : vector<2x32xf32>
    %179 = arith.divf %177, %178 : vector<2x32xf32>
    %180 = vector.extract_strided_slice %170 {offsets = [0, 32], sizes = [2, 32], strides = [1, 1]} : vector<2x96xf32> to vector<2x32xf32>
    %181 = vector.extract_strided_slice %171 {offsets = [0, 32], sizes = [2, 32], strides = [1, 1]} : vector<2x96xf32> to vector<2x32xf32>
    %182 = arith.addf %180, %181 : vector<2x32xf32>
    %183 = arith.negf %182 : vector<2x32xf32>
    %184 = math.exp %183 : vector<2x32xf32>
    %cst_47 = arith.constant 1.000000e+00 : f32
    %185 = vector.broadcast %cst_47 : f32 to vector<2x32xf32>
    %186 = arith.addf %185, %184 : vector<2x32xf32>
    %187 = arith.divf %185, %186 : vector<2x32xf32>
    %188 = vector.extract_strided_slice %170 {offsets = [0, 64], sizes = [2, 32], strides = [1, 1]} : vector<2x96xf32> to vector<2x32xf32>
    %189 = vector.extract_strided_slice %171 {offsets = [0, 64], sizes = [2, 32], strides = [1, 1]} : vector<2x96xf32> to vector<2x32xf32>
    %190 = arith.addf %189, %11 : vector<2x32xf32>
    %191 = arith.mulf %179, %190 : vector<2x32xf32>
    %192 = arith.addf %188, %191 : vector<2x32xf32>
    %193 = math.tanh %192 : vector<2x32xf32>
    %cst_48 = arith.constant 1.000000e+00 : f32
    %194 = vector.broadcast %cst_48 : f32 to vector<2x32xf32>
    %195 = arith.subf %194, %187 : vector<2x32xf32>
    %196 = arith.mulf %195, %193 : vector<2x32xf32>
    %197 = arith.mulf %187, %139 : vector<2x32xf32>
    %198 = arith.addf %196, %197 : vector<2x32xf32>
    %199 = vector.extract_strided_slice %17 {offsets = [6, 0], sizes = [2, 96], strides = [1, 1]} : vector<16x96xf32> to vector<2x96xf32>
    %cst_49 = arith.constant dense<0.000000e+00> : vector<2x96xf32>
    %200 = tpu.matmul %168, %2, %cst_49 {dimension_numbers = #tpu.dot_dimension_numbers<[1], [0], [0], [1], [0, 0, 1, 1], [], []>} : vector<2x32xf32>, vector<32x96xf32>, vector<2x96xf32> -> vector<2x96xf32>
    %201 = vector.extract_strided_slice %199 {offsets = [0, 0], sizes = [2, 32], strides = [1, 1]} : vector<2x96xf32> to vector<2x32xf32>
    %202 = vector.extract_strided_slice %200 {offsets = [0, 0], sizes = [2, 32], strides = [1, 1]} : vector<2x96xf32> to vector<2x32xf32>
    %203 = arith.addf %201, %202 : vector<2x32xf32>
    %204 = arith.negf %203 : vector<2x32xf32>
    %205 = math.exp %204 : vector<2x32xf32>
    %cst_50 = arith.constant 1.000000e+00 : f32
    %206 = vector.broadcast %cst_50 : f32 to vector<2x32xf32>
    %207 = arith.addf %206, %205 : vector<2x32xf32>
    %208 = arith.divf %206, %207 : vector<2x32xf32>
    %209 = vector.extract_strided_slice %199 {offsets = [0, 32], sizes = [2, 32], strides = [1, 1]} : vector<2x96xf32> to vector<2x32xf32>
    %210 = vector.extract_strided_slice %200 {offsets = [0, 32], sizes = [2, 32], strides = [1, 1]} : vector<2x96xf32> to vector<2x32xf32>
    %211 = arith.addf %209, %210 : vector<2x32xf32>
    %212 = arith.negf %211 : vector<2x32xf32>
    %213 = math.exp %212 : vector<2x32xf32>
    %cst_51 = arith.constant 1.000000e+00 : f32
    %214 = vector.broadcast %cst_51 : f32 to vector<2x32xf32>
    %215 = arith.addf %214, %213 : vector<2x32xf32>
    %216 = arith.divf %214, %215 : vector<2x32xf32>
    %217 = vector.extract_strided_slice %199 {offsets = [0, 64], sizes = [2, 32], strides = [1, 1]} : vector<2x96xf32> to vector<2x32xf32>
    %218 = vector.extract_strided_slice %200 {offsets = [0, 64], sizes = [2, 32], strides = [1, 1]} : vector<2x96xf32> to vector<2x32xf32>
    %219 = arith.addf %218, %9 : vector<2x32xf32>
    %220 = arith.mulf %208, %219 : vector<2x32xf32>
    %221 = arith.addf %217, %220 : vector<2x32xf32>
    %222 = math.tanh %221 : vector<2x32xf32>
    %cst_52 = arith.constant 1.000000e+00 : f32
    %223 = vector.broadcast %cst_52 : f32 to vector<2x32xf32>
    %224 = arith.subf %223, %216 : vector<2x32xf32>
    %225 = arith.mulf %224, %222 : vector<2x32xf32>
    %226 = arith.mulf %216, %168 : vector<2x32xf32>
    %227 = arith.addf %225, %226 : vector<2x32xf32>
    %cst_53 = arith.constant dense<0.000000e+00> : vector<2x96xf32>
    %228 = tpu.matmul %227, %1, %cst_53 {dimension_numbers = #tpu.dot_dimension_numbers<[1], [0], [0], [1], [0, 0, 1, 1], [], []>} : vector<2x32xf32>, vector<32x96xf32>, vector<2x96xf32> -> vector<2x96xf32>
    %229 = arith.addf %228, %13 : vector<2x96xf32>
    %cst_54 = arith.constant dense<0.000000e+00> : vector<2x96xf32>
    %230 = tpu.matmul %198, %3, %cst_54 {dimension_numbers = #tpu.dot_dimension_numbers<[1], [0], [0], [1], [0, 0, 1, 1], [], []>} : vector<2x32xf32>, vector<32x96xf32>, vector<2x96xf32> -> vector<2x96xf32>
    %231 = vector.extract_strided_slice %229 {offsets = [0, 0], sizes = [2, 32], strides = [1, 1]} : vector<2x96xf32> to vector<2x32xf32>
    %232 = vector.extract_strided_slice %230 {offsets = [0, 0], sizes = [2, 32], strides = [1, 1]} : vector<2x96xf32> to vector<2x32xf32>
    %233 = arith.addf %231, %232 : vector<2x32xf32>
    %234 = arith.negf %233 : vector<2x32xf32>
    %235 = math.exp %234 : vector<2x32xf32>
    %cst_55 = arith.constant 1.000000e+00 : f32
    %236 = vector.broadcast %cst_55 : f32 to vector<2x32xf32>
    %237 = arith.addf %236, %235 : vector<2x32xf32>
    %238 = arith.divf %236, %237 : vector<2x32xf32>
    %239 = vector.extract_strided_slice %229 {offsets = [0, 32], sizes = [2, 32], strides = [1, 1]} : vector<2x96xf32> to vector<2x32xf32>
    %240 = vector.extract_strided_slice %230 {offsets = [0, 32], sizes = [2, 32], strides = [1, 1]} : vector<2x96xf32> to vector<2x32xf32>
    %241 = arith.addf %239, %240 : vector<2x32xf32>
    %242 = arith.negf %241 : vector<2x32xf32>
    %243 = math.exp %242 : vector<2x32xf32>
    %cst_56 = arith.constant 1.000000e+00 : f32
    %244 = vector.broadcast %cst_56 : f32 to vector<2x32xf32>
    %245 = arith.addf %244, %243 : vector<2x32xf32>
    %246 = arith.divf %244, %245 : vector<2x32xf32>
    %247 = vector.extract_strided_slice %229 {offsets = [0, 64], sizes = [2, 32], strides = [1, 1]} : vector<2x96xf32> to vector<2x32xf32>
    %248 = vector.extract_strided_slice %230 {offsets = [0, 64], sizes = [2, 32], strides = [1, 1]} : vector<2x96xf32> to vector<2x32xf32>
    %249 = arith.addf %248, %11 : vector<2x32xf32>
    %250 = arith.mulf %238, %249 : vector<2x32xf32>
    %251 = arith.addf %247, %250 : vector<2x32xf32>
    %252 = math.tanh %251 : vector<2x32xf32>
    %cst_57 = arith.constant 1.000000e+00 : f32
    %253 = vector.broadcast %cst_57 : f32 to vector<2x32xf32>
    %254 = arith.subf %253, %246 : vector<2x32xf32>
    %255 = arith.mulf %254, %252 : vector<2x32xf32>
    %256 = arith.mulf %246, %198 : vector<2x32xf32>
    %257 = arith.addf %255, %256 : vector<2x32xf32>
    %258 = vector.extract_strided_slice %17 {offsets = [8, 0], sizes = [2, 96], strides = [1, 1]} : vector<16x96xf32> to vector<2x96xf32>
    %cst_58 = arith.constant dense<0.000000e+00> : vector<2x96xf32>
    %259 = tpu.matmul %227, %2, %cst_58 {dimension_numbers = #tpu.dot_dimension_numbers<[1], [0], [0], [1], [0, 0, 1, 1], [], []>} : vector<2x32xf32>, vector<32x96xf32>, vector<2x96xf32> -> vector<2x96xf32>
    %260 = vector.extract_strided_slice %258 {offsets = [0, 0], sizes = [2, 32], strides = [1, 1]} : vector<2x96xf32> to vector<2x32xf32>
    %261 = vector.extract_strided_slice %259 {offsets = [0, 0], sizes = [2, 32], strides = [1, 1]} : vector<2x96xf32> to vector<2x32xf32>
    %262 = arith.addf %260, %261 : vector<2x32xf32>
    %263 = arith.negf %262 : vector<2x32xf32>
    %264 = math.exp %263 : vector<2x32xf32>
    %cst_59 = arith.constant 1.000000e+00 : f32
    %265 = vector.broadcast %cst_59 : f32 to vector<2x32xf32>
    %266 = arith.addf %265, %264 : vector<2x32xf32>
    %267 = arith.divf %265, %266 : vector<2x32xf32>
    %268 = vector.extract_strided_slice %258 {offsets = [0, 32], sizes = [2, 32], strides = [1, 1]} : vector<2x96xf32> to vector<2x32xf32>
    %269 = vector.extract_strided_slice %259 {offsets = [0, 32], sizes = [2, 32], strides = [1, 1]} : vector<2x96xf32> to vector<2x32xf32>
    %270 = arith.addf %268, %269 : vector<2x32xf32>
    %271 = arith.negf %270 : vector<2x32xf32>
    %272 = math.exp %271 : vector<2x32xf32>
    %cst_60 = arith.constant 1.000000e+00 : f32
    %273 = vector.broadcast %cst_60 : f32 to vector<2x32xf32>
    %274 = arith.addf %273, %272 : vector<2x32xf32>
    %275 = arith.divf %273, %274 : vector<2x32xf32>
    %276 = vector.extract_strided_slice %258 {offsets = [0, 64], sizes = [2, 32], strides = [1, 1]} : vector<2x96xf32> to vector<2x32xf32>
    %277 = vector.extract_strided_slice %259 {offsets = [0, 64], sizes = [2, 32], strides = [1, 1]} : vector<2x96xf32> to vector<2x32xf32>
    %278 = arith.addf %277, %9 : vector<2x32xf32>
    %279 = arith.mulf %267, %278 : vector<2x32xf32>
    %280 = arith.addf %276, %279 : vector<2x32xf32>
    %281 = math.tanh %280 : vector<2x32xf32>
    %cst_61 = arith.constant 1.000000e+00 : f32
    %282 = vector.broadcast %cst_61 : f32 to vector<2x32xf32>
    %283 = arith.subf %282, %275 : vector<2x32xf32>
    %284 = arith.mulf %283, %281 : vector<2x32xf32>
    %285 = arith.mulf %275, %227 : vector<2x32xf32>
    %286 = arith.addf %284, %285 : vector<2x32xf32>
    %cst_62 = arith.constant dense<0.000000e+00> : vector<2x96xf32>
    %287 = tpu.matmul %286, %1, %cst_62 {dimension_numbers = #tpu.dot_dimension_numbers<[1], [0], [0], [1], [0, 0, 1, 1], [], []>} : vector<2x32xf32>, vector<32x96xf32>, vector<2x96xf32> -> vector<2x96xf32>
    %288 = arith.addf %287, %13 : vector<2x96xf32>
    %cst_63 = arith.constant dense<0.000000e+00> : vector<2x96xf32>
    %289 = tpu.matmul %257, %3, %cst_63 {dimension_numbers = #tpu.dot_dimension_numbers<[1], [0], [0], [1], [0, 0, 1, 1], [], []>} : vector<2x32xf32>, vector<32x96xf32>, vector<2x96xf32> -> vector<2x96xf32>
    %290 = vector.extract_strided_slice %288 {offsets = [0, 0], sizes = [2, 32], strides = [1, 1]} : vector<2x96xf32> to vector<2x32xf32>
    %291 = vector.extract_strided_slice %289 {offsets = [0, 0], sizes = [2, 32], strides = [1, 1]} : vector<2x96xf32> to vector<2x32xf32>
    %292 = arith.addf %290, %291 : vector<2x32xf32>
    %293 = arith.negf %292 : vector<2x32xf32>
    %294 = math.exp %293 : vector<2x32xf32>
    %cst_64 = arith.constant 1.000000e+00 : f32
    %295 = vector.broadcast %cst_64 : f32 to vector<2x32xf32>
    %296 = arith.addf %295, %294 : vector<2x32xf32>
    %297 = arith.divf %295, %296 : vector<2x32xf32>
    %298 = vector.extract_strided_slice %288 {offsets = [0, 32], sizes = [2, 32], strides = [1, 1]} : vector<2x96xf32> to vector<2x32xf32>
    %299 = vector.extract_strided_slice %289 {offsets = [0, 32], sizes = [2, 32], strides = [1, 1]} : vector<2x96xf32> to vector<2x32xf32>
    %300 = arith.addf %298, %299 : vector<2x32xf32>
    %301 = arith.negf %300 : vector<2x32xf32>
    %302 = math.exp %301 : vector<2x32xf32>
    %cst_65 = arith.constant 1.000000e+00 : f32
    %303 = vector.broadcast %cst_65 : f32 to vector<2x32xf32>
    %304 = arith.addf %303, %302 : vector<2x32xf32>
    %305 = arith.divf %303, %304 : vector<2x32xf32>
    %306 = vector.extract_strided_slice %288 {offsets = [0, 64], sizes = [2, 32], strides = [1, 1]} : vector<2x96xf32> to vector<2x32xf32>
    %307 = vector.extract_strided_slice %289 {offsets = [0, 64], sizes = [2, 32], strides = [1, 1]} : vector<2x96xf32> to vector<2x32xf32>
    %308 = arith.addf %307, %11 : vector<2x32xf32>
    %309 = arith.mulf %297, %308 : vector<2x32xf32>
    %310 = arith.addf %306, %309 : vector<2x32xf32>
    %311 = math.tanh %310 : vector<2x32xf32>
    %cst_66 = arith.constant 1.000000e+00 : f32
    %312 = vector.broadcast %cst_66 : f32 to vector<2x32xf32>
    %313 = arith.subf %312, %305 : vector<2x32xf32>
    %314 = arith.mulf %313, %311 : vector<2x32xf32>
    %315 = arith.mulf %305, %257 : vector<2x32xf32>
    %316 = arith.addf %314, %315 : vector<2x32xf32>
    %317 = vector.extract_strided_slice %17 {offsets = [10, 0], sizes = [2, 96], strides = [1, 1]} : vector<16x96xf32> to vector<2x96xf32>
    %cst_67 = arith.constant dense<0.000000e+00> : vector<2x96xf32>
    %318 = tpu.matmul %286, %2, %cst_67 {dimension_numbers = #tpu.dot_dimension_numbers<[1], [0], [0], [1], [0, 0, 1, 1], [], []>} : vector<2x32xf32>, vector<32x96xf32>, vector<2x96xf32> -> vector<2x96xf32>
    %319 = vector.extract_strided_slice %317 {offsets = [0, 0], sizes = [2, 32], strides = [1, 1]} : vector<2x96xf32> to vector<2x32xf32>
    %320 = vector.extract_strided_slice %318 {offsets = [0, 0], sizes = [2, 32], strides = [1, 1]} : vector<2x96xf32> to vector<2x32xf32>
    %321 = arith.addf %319, %320 : vector<2x32xf32>
    %322 = arith.negf %321 : vector<2x32xf32>
    %323 = math.exp %322 : vector<2x32xf32>
    %cst_68 = arith.constant 1.000000e+00 : f32
    %324 = vector.broadcast %cst_68 : f32 to vector<2x32xf32>
    %325 = arith.addf %324, %323 : vector<2x32xf32>
    %326 = arith.divf %324, %325 : vector<2x32xf32>
    %327 = vector.extract_strided_slice %317 {offsets = [0, 32], sizes = [2, 32], strides = [1, 1]} : vector<2x96xf32> to vector<2x32xf32>
    %328 = vector.extract_strided_slice %318 {offsets = [0, 32], sizes = [2, 32], strides = [1, 1]} : vector<2x96xf32> to vector<2x32xf32>
    %329 = arith.addf %327, %328 : vector<2x32xf32>
    %330 = arith.negf %329 : vector<2x32xf32>
    %331 = math.exp %330 : vector<2x32xf32>
    %cst_69 = arith.constant 1.000000e+00 : f32
    %332 = vector.broadcast %cst_69 : f32 to vector<2x32xf32>
    %333 = arith.addf %332, %331 : vector<2x32xf32>
    %334 = arith.divf %332, %333 : vector<2x32xf32>
    %335 = vector.extract_strided_slice %317 {offsets = [0, 64], sizes = [2, 32], strides = [1, 1]} : vector<2x96xf32> to vector<2x32xf32>
    %336 = vector.extract_strided_slice %318 {offsets = [0, 64], sizes = [2, 32], strides = [1, 1]} : vector<2x96xf32> to vector<2x32xf32>
    %337 = arith.addf %336, %9 : vector<2x32xf32>
    %338 = arith.mulf %326, %337 : vector<2x32xf32>
    %339 = arith.addf %335, %338 : vector<2x32xf32>
    %340 = math.tanh %339 : vector<2x32xf32>
    %cst_70 = arith.constant 1.000000e+00 : f32
    %341 = vector.broadcast %cst_70 : f32 to vector<2x32xf32>
    %342 = arith.subf %341, %334 : vector<2x32xf32>
    %343 = arith.mulf %342, %340 : vector<2x32xf32>
    %344 = arith.mulf %334, %286 : vector<2x32xf32>
    %345 = arith.addf %343, %344 : vector<2x32xf32>
    %cst_71 = arith.constant dense<0.000000e+00> : vector<2x96xf32>
    %346 = tpu.matmul %345, %1, %cst_71 {dimension_numbers = #tpu.dot_dimension_numbers<[1], [0], [0], [1], [0, 0, 1, 1], [], []>} : vector<2x32xf32>, vector<32x96xf32>, vector<2x96xf32> -> vector<2x96xf32>
    %347 = arith.addf %346, %13 : vector<2x96xf32>
    %cst_72 = arith.constant dense<0.000000e+00> : vector<2x96xf32>
    %348 = tpu.matmul %316, %3, %cst_72 {dimension_numbers = #tpu.dot_dimension_numbers<[1], [0], [0], [1], [0, 0, 1, 1], [], []>} : vector<2x32xf32>, vector<32x96xf32>, vector<2x96xf32> -> vector<2x96xf32>
    %349 = vector.extract_strided_slice %347 {offsets = [0, 0], sizes = [2, 32], strides = [1, 1]} : vector<2x96xf32> to vector<2x32xf32>
    %350 = vector.extract_strided_slice %348 {offsets = [0, 0], sizes = [2, 32], strides = [1, 1]} : vector<2x96xf32> to vector<2x32xf32>
    %351 = arith.addf %349, %350 : vector<2x32xf32>
    %352 = arith.negf %351 : vector<2x32xf32>
    %353 = math.exp %352 : vector<2x32xf32>
    %cst_73 = arith.constant 1.000000e+00 : f32
    %354 = vector.broadcast %cst_73 : f32 to vector<2x32xf32>
    %355 = arith.addf %354, %353 : vector<2x32xf32>
    %356 = arith.divf %354, %355 : vector<2x32xf32>
    %357 = vector.extract_strided_slice %347 {offsets = [0, 32], sizes = [2, 32], strides = [1, 1]} : vector<2x96xf32> to vector<2x32xf32>
    %358 = vector.extract_strided_slice %348 {offsets = [0, 32], sizes = [2, 32], strides = [1, 1]} : vector<2x96xf32> to vector<2x32xf32>
    %359 = arith.addf %357, %358 : vector<2x32xf32>
    %360 = arith.negf %359 : vector<2x32xf32>
    %361 = math.exp %360 : vector<2x32xf32>
    %cst_74 = arith.constant 1.000000e+00 : f32
    %362 = vector.broadcast %cst_74 : f32 to vector<2x32xf32>
    %363 = arith.addf %362, %361 : vector<2x32xf32>
    %364 = arith.divf %362, %363 : vector<2x32xf32>
    %365 = vector.extract_strided_slice %347 {offsets = [0, 64], sizes = [2, 32], strides = [1, 1]} : vector<2x96xf32> to vector<2x32xf32>
    %366 = vector.extract_strided_slice %348 {offsets = [0, 64], sizes = [2, 32], strides = [1, 1]} : vector<2x96xf32> to vector<2x32xf32>
    %367 = arith.addf %366, %11 : vector<2x32xf32>
    %368 = arith.mulf %356, %367 : vector<2x32xf32>
    %369 = arith.addf %365, %368 : vector<2x32xf32>
    %370 = math.tanh %369 : vector<2x32xf32>
    %cst_75 = arith.constant 1.000000e+00 : f32
    %371 = vector.broadcast %cst_75 : f32 to vector<2x32xf32>
    %372 = arith.subf %371, %364 : vector<2x32xf32>
    %373 = arith.mulf %372, %370 : vector<2x32xf32>
    %374 = arith.mulf %364, %316 : vector<2x32xf32>
    %375 = arith.addf %373, %374 : vector<2x32xf32>
    %376 = vector.extract_strided_slice %17 {offsets = [12, 0], sizes = [2, 96], strides = [1, 1]} : vector<16x96xf32> to vector<2x96xf32>
    %cst_76 = arith.constant dense<0.000000e+00> : vector<2x96xf32>
    %377 = tpu.matmul %345, %2, %cst_76 {dimension_numbers = #tpu.dot_dimension_numbers<[1], [0], [0], [1], [0, 0, 1, 1], [], []>} : vector<2x32xf32>, vector<32x96xf32>, vector<2x96xf32> -> vector<2x96xf32>
    %378 = vector.extract_strided_slice %376 {offsets = [0, 0], sizes = [2, 32], strides = [1, 1]} : vector<2x96xf32> to vector<2x32xf32>
    %379 = vector.extract_strided_slice %377 {offsets = [0, 0], sizes = [2, 32], strides = [1, 1]} : vector<2x96xf32> to vector<2x32xf32>
    %380 = arith.addf %378, %379 : vector<2x32xf32>
    %381 = arith.negf %380 : vector<2x32xf32>
    %382 = math.exp %381 : vector<2x32xf32>
    %cst_77 = arith.constant 1.000000e+00 : f32
    %383 = vector.broadcast %cst_77 : f32 to vector<2x32xf32>
    %384 = arith.addf %383, %382 : vector<2x32xf32>
    %385 = arith.divf %383, %384 : vector<2x32xf32>
    %386 = vector.extract_strided_slice %376 {offsets = [0, 32], sizes = [2, 32], strides = [1, 1]} : vector<2x96xf32> to vector<2x32xf32>
    %387 = vector.extract_strided_slice %377 {offsets = [0, 32], sizes = [2, 32], strides = [1, 1]} : vector<2x96xf32> to vector<2x32xf32>
    %388 = arith.addf %386, %387 : vector<2x32xf32>
    %389 = arith.negf %388 : vector<2x32xf32>
    %390 = math.exp %389 : vector<2x32xf32>
    %cst_78 = arith.constant 1.000000e+00 : f32
    %391 = vector.broadcast %cst_78 : f32 to vector<2x32xf32>
    %392 = arith.addf %391, %390 : vector<2x32xf32>
    %393 = arith.divf %391, %392 : vector<2x32xf32>
    %394 = vector.extract_strided_slice %376 {offsets = [0, 64], sizes = [2, 32], strides = [1, 1]} : vector<2x96xf32> to vector<2x32xf32>
    %395 = vector.extract_strided_slice %377 {offsets = [0, 64], sizes = [2, 32], strides = [1, 1]} : vector<2x96xf32> to vector<2x32xf32>
    %396 = arith.addf %395, %9 : vector<2x32xf32>
    %397 = arith.mulf %385, %396 : vector<2x32xf32>
    %398 = arith.addf %394, %397 : vector<2x32xf32>
    %399 = math.tanh %398 : vector<2x32xf32>
    %cst_79 = arith.constant 1.000000e+00 : f32
    %400 = vector.broadcast %cst_79 : f32 to vector<2x32xf32>
    %401 = arith.subf %400, %393 : vector<2x32xf32>
    %402 = arith.mulf %401, %399 : vector<2x32xf32>
    %403 = arith.mulf %393, %345 : vector<2x32xf32>
    %404 = arith.addf %402, %403 : vector<2x32xf32>
    %cst_80 = arith.constant dense<0.000000e+00> : vector<2x96xf32>
    %405 = tpu.matmul %404, %1, %cst_80 {dimension_numbers = #tpu.dot_dimension_numbers<[1], [0], [0], [1], [0, 0, 1, 1], [], []>} : vector<2x32xf32>, vector<32x96xf32>, vector<2x96xf32> -> vector<2x96xf32>
    %406 = arith.addf %405, %13 : vector<2x96xf32>
    %cst_81 = arith.constant dense<0.000000e+00> : vector<2x96xf32>
    %407 = tpu.matmul %375, %3, %cst_81 {dimension_numbers = #tpu.dot_dimension_numbers<[1], [0], [0], [1], [0, 0, 1, 1], [], []>} : vector<2x32xf32>, vector<32x96xf32>, vector<2x96xf32> -> vector<2x96xf32>
    %408 = vector.extract_strided_slice %406 {offsets = [0, 0], sizes = [2, 32], strides = [1, 1]} : vector<2x96xf32> to vector<2x32xf32>
    %409 = vector.extract_strided_slice %407 {offsets = [0, 0], sizes = [2, 32], strides = [1, 1]} : vector<2x96xf32> to vector<2x32xf32>
    %410 = arith.addf %408, %409 : vector<2x32xf32>
    %411 = arith.negf %410 : vector<2x32xf32>
    %412 = math.exp %411 : vector<2x32xf32>
    %cst_82 = arith.constant 1.000000e+00 : f32
    %413 = vector.broadcast %cst_82 : f32 to vector<2x32xf32>
    %414 = arith.addf %413, %412 : vector<2x32xf32>
    %415 = arith.divf %413, %414 : vector<2x32xf32>
    %416 = vector.extract_strided_slice %406 {offsets = [0, 32], sizes = [2, 32], strides = [1, 1]} : vector<2x96xf32> to vector<2x32xf32>
    %417 = vector.extract_strided_slice %407 {offsets = [0, 32], sizes = [2, 32], strides = [1, 1]} : vector<2x96xf32> to vector<2x32xf32>
    %418 = arith.addf %416, %417 : vector<2x32xf32>
    %419 = arith.negf %418 : vector<2x32xf32>
    %420 = math.exp %419 : vector<2x32xf32>
    %cst_83 = arith.constant 1.000000e+00 : f32
    %421 = vector.broadcast %cst_83 : f32 to vector<2x32xf32>
    %422 = arith.addf %421, %420 : vector<2x32xf32>
    %423 = arith.divf %421, %422 : vector<2x32xf32>
    %424 = vector.extract_strided_slice %406 {offsets = [0, 64], sizes = [2, 32], strides = [1, 1]} : vector<2x96xf32> to vector<2x32xf32>
    %425 = vector.extract_strided_slice %407 {offsets = [0, 64], sizes = [2, 32], strides = [1, 1]} : vector<2x96xf32> to vector<2x32xf32>
    %426 = arith.addf %425, %11 : vector<2x32xf32>
    %427 = arith.mulf %415, %426 : vector<2x32xf32>
    %428 = arith.addf %424, %427 : vector<2x32xf32>
    %429 = math.tanh %428 : vector<2x32xf32>
    %cst_84 = arith.constant 1.000000e+00 : f32
    %430 = vector.broadcast %cst_84 : f32 to vector<2x32xf32>
    %431 = arith.subf %430, %423 : vector<2x32xf32>
    %432 = arith.mulf %431, %429 : vector<2x32xf32>
    %433 = arith.mulf %423, %375 : vector<2x32xf32>
    %434 = arith.addf %432, %433 : vector<2x32xf32>
    %435 = vector.extract_strided_slice %17 {offsets = [14, 0], sizes = [2, 96], strides = [1, 1]} : vector<16x96xf32> to vector<2x96xf32>
    %cst_85 = arith.constant dense<0.000000e+00> : vector<2x96xf32>
    %436 = tpu.matmul %404, %2, %cst_85 {dimension_numbers = #tpu.dot_dimension_numbers<[1], [0], [0], [1], [0, 0, 1, 1], [], []>} : vector<2x32xf32>, vector<32x96xf32>, vector<2x96xf32> -> vector<2x96xf32>
    %437 = vector.extract_strided_slice %435 {offsets = [0, 0], sizes = [2, 32], strides = [1, 1]} : vector<2x96xf32> to vector<2x32xf32>
    %438 = vector.extract_strided_slice %436 {offsets = [0, 0], sizes = [2, 32], strides = [1, 1]} : vector<2x96xf32> to vector<2x32xf32>
    %439 = arith.addf %437, %438 : vector<2x32xf32>
    %440 = arith.negf %439 : vector<2x32xf32>
    %441 = math.exp %440 : vector<2x32xf32>
    %cst_86 = arith.constant 1.000000e+00 : f32
    %442 = vector.broadcast %cst_86 : f32 to vector<2x32xf32>
    %443 = arith.addf %442, %441 : vector<2x32xf32>
    %444 = arith.divf %442, %443 : vector<2x32xf32>
    %445 = vector.extract_strided_slice %435 {offsets = [0, 32], sizes = [2, 32], strides = [1, 1]} : vector<2x96xf32> to vector<2x32xf32>
    %446 = vector.extract_strided_slice %436 {offsets = [0, 32], sizes = [2, 32], strides = [1, 1]} : vector<2x96xf32> to vector<2x32xf32>
    %447 = arith.addf %445, %446 : vector<2x32xf32>
    %448 = arith.negf %447 : vector<2x32xf32>
    %449 = math.exp %448 : vector<2x32xf32>
    %cst_87 = arith.constant 1.000000e+00 : f32
    %450 = vector.broadcast %cst_87 : f32 to vector<2x32xf32>
    %451 = arith.addf %450, %449 : vector<2x32xf32>
    %452 = arith.divf %450, %451 : vector<2x32xf32>
    %453 = vector.extract_strided_slice %435 {offsets = [0, 64], sizes = [2, 32], strides = [1, 1]} : vector<2x96xf32> to vector<2x32xf32>
    %454 = vector.extract_strided_slice %436 {offsets = [0, 64], sizes = [2, 32], strides = [1, 1]} : vector<2x96xf32> to vector<2x32xf32>
    %455 = arith.addf %454, %9 : vector<2x32xf32>
    %456 = arith.mulf %444, %455 : vector<2x32xf32>
    %457 = arith.addf %453, %456 : vector<2x32xf32>
    %458 = math.tanh %457 : vector<2x32xf32>
    %cst_88 = arith.constant 1.000000e+00 : f32
    %459 = vector.broadcast %cst_88 : f32 to vector<2x32xf32>
    %460 = arith.subf %459, %452 : vector<2x32xf32>
    %461 = arith.mulf %460, %458 : vector<2x32xf32>
    %462 = arith.mulf %452, %404 : vector<2x32xf32>
    %463 = arith.addf %461, %462 : vector<2x32xf32>
    %cst_89 = arith.constant dense<0.000000e+00> : vector<2x96xf32>
    %464 = tpu.matmul %463, %1, %cst_89 {dimension_numbers = #tpu.dot_dimension_numbers<[1], [0], [0], [1], [0, 0, 1, 1], [], []>} : vector<2x32xf32>, vector<32x96xf32>, vector<2x96xf32> -> vector<2x96xf32>
    %465 = arith.addf %464, %13 : vector<2x96xf32>
    %cst_90 = arith.constant dense<0.000000e+00> : vector<2x96xf32>
    %466 = tpu.matmul %434, %3, %cst_90 {dimension_numbers = #tpu.dot_dimension_numbers<[1], [0], [0], [1], [0, 0, 1, 1], [], []>} : vector<2x32xf32>, vector<32x96xf32>, vector<2x96xf32> -> vector<2x96xf32>
    %467 = vector.extract_strided_slice %465 {offsets = [0, 0], sizes = [2, 32], strides = [1, 1]} : vector<2x96xf32> to vector<2x32xf32>
    %468 = vector.extract_strided_slice %466 {offsets = [0, 0], sizes = [2, 32], strides = [1, 1]} : vector<2x96xf32> to vector<2x32xf32>
    %469 = arith.addf %467, %468 : vector<2x32xf32>
    %470 = arith.negf %469 : vector<2x32xf32>
    %471 = math.exp %470 : vector<2x32xf32>
    %cst_91 = arith.constant 1.000000e+00 : f32
    %472 = vector.broadcast %cst_91 : f32 to vector<2x32xf32>
    %473 = arith.addf %472, %471 : vector<2x32xf32>
    %474 = arith.divf %472, %473 : vector<2x32xf32>
    %475 = vector.extract_strided_slice %465 {offsets = [0, 32], sizes = [2, 32], strides = [1, 1]} : vector<2x96xf32> to vector<2x32xf32>
    %476 = vector.extract_strided_slice %466 {offsets = [0, 32], sizes = [2, 32], strides = [1, 1]} : vector<2x96xf32> to vector<2x32xf32>
    %477 = arith.addf %475, %476 : vector<2x32xf32>
    %478 = arith.negf %477 : vector<2x32xf32>
    %479 = math.exp %478 : vector<2x32xf32>
    %cst_92 = arith.constant 1.000000e+00 : f32
    %480 = vector.broadcast %cst_92 : f32 to vector<2x32xf32>
    %481 = arith.addf %480, %479 : vector<2x32xf32>
    %482 = arith.divf %480, %481 : vector<2x32xf32>
    %483 = vector.extract_strided_slice %465 {offsets = [0, 64], sizes = [2, 32], strides = [1, 1]} : vector<2x96xf32> to vector<2x32xf32>
    %484 = vector.extract_strided_slice %466 {offsets = [0, 64], sizes = [2, 32], strides = [1, 1]} : vector<2x96xf32> to vector<2x32xf32>
    %485 = arith.addf %484, %11 : vector<2x32xf32>
    %486 = arith.mulf %474, %485 : vector<2x32xf32>
    %487 = arith.addf %483, %486 : vector<2x32xf32>
    %488 = math.tanh %487 : vector<2x32xf32>
    %cst_93 = arith.constant 1.000000e+00 : f32
    %489 = vector.broadcast %cst_93 : f32 to vector<2x32xf32>
    %490 = arith.subf %489, %482 : vector<2x32xf32>
    %491 = arith.mulf %490, %488 : vector<2x32xf32>
    %492 = arith.mulf %482, %434 : vector<2x32xf32>
    %493 = arith.addf %491, %492 : vector<2x32xf32>
    %c0_94 = arith.constant 0 : index
    %c0_95 = arith.constant 0 : index
    %c0_96 = arith.constant 0 : index
    %494 = vector.load %arg13[%c0_94, %c0_95, %c0_96] : memref<2x2x32xf32, #tpu.memory_space<vmem>>, vector<1x2x32xf32>
    %495 = vector.shape_cast %494 : vector<1x2x32xf32> to vector<2x32xf32>
    %496 = vector.shape_cast %463 : vector<2x32xf32> to vector<1x2x32xf32>
    tpu.vector_store %arg13[%c0_94, %c0_95, %c0_96], %496 {strides = array<i32>} : memref<2x2x32xf32, #tpu.memory_space<vmem>>, vector<1x2x32xf32>,
    %c1_97 = arith.constant 1 : index
    %c0_98 = arith.constant 0 : index
    %c0_99 = arith.constant 0 : index
    %497 = vector.load %arg13[%c1_97, %c0_98, %c0_99] : memref<2x2x32xf32, #tpu.memory_space<vmem>>, vector<1x2x32xf32>
    %498 = vector.shape_cast %497 : vector<1x2x32xf32> to vector<2x32xf32>
    %499 = vector.shape_cast %493 : vector<2x32xf32> to vector<1x2x32xf32>
    tpu.vector_store %arg13[%c1_97, %c0_98, %c0_99], %499 {strides = array<i32>} : memref<2x2x32xf32, #tpu.memory_space<vmem>>, vector<1x2x32xf32>,
    %cst_100 = arith.constant 0.000000e+00 : f32
    %500 = vector.broadcast %cst_100 : f32 to vector<2x32xf32>
    %501 = arith.maximumf %493, %500 : vector<2x32xf32>
    %c0_101 = arith.constant 0 : index
    %c0_102 = arith.constant 0 : index
    %502 = vector.load %arg10[%c0_101, %c0_102] : memref<32x8xf32, #tpu.memory_space<vmem>>, vector<32x8xf32>
    %cst_103 = arith.constant dense<0.000000e+00> : vector<2x8xf32>
    %503 = tpu.matmul %501, %502, %cst_103 {dimension_numbers = #tpu.dot_dimension_numbers<[1], [0], [0], [1], [0, 0, 1, 1], [], []>} : vector<2x32xf32>, vector<32x8xf32>, vector<2x8xf32> -> vector<2x8xf32>
    %c0_104 = arith.constant 0 : index
    %c0_105 = arith.constant 0 : index
    %504 = vector.load %arg11[%c0_104, %c0_105] : memref<1x8xf32, #tpu.memory_space<vmem>>, vector<1x8xf32>
    %505 = vector.broadcast %504 : vector<1x8xf32> to vector<2x8xf32>
    %506 = arith.addf %503, %505 : vector<2x8xf32>
    %c0_106 = arith.constant 0 : index
    %c0_107 = arith.constant 0 : index
    %507 = vector.load %arg12[%c0_106, %c0_107] : memref<2x8xf32, #tpu.memory_space<vmem>>, vector<2x8xf32>
    tpu.vector_store %arg12[%c0_106, %c0_107], %506 {strides = array<i32>} : memref<2x8xf32, #tpu.memory_space<vmem>>, vector<2x8xf32>,
    return
  }
}

</mosaic_0001>

<bundles_post_ra>
// kernel: tpu_custom_call.1
= control target key start
LH: loop header
LB: loop body
LE: loop exit
PB: predicated region body
PF: predicated region fallthrough
CT: control target
= control target key end

     0   :  { %19 = vsyncpa [#allocation3], 0  ;;  %s2234_s0 = inlined_call_operand.vmem [shape: f32[16,4], index: 0, kind: input, shape index: {}]   ;;  %s2235_s1 = inlined_call_operand.vmem [shape: f32[2,2,32], index: 1, kind: input, shape index: {}]   ;;  %s2236_s2 = inlined_call_operand.vmem [shape: f32[4,96], index: 2, kind: input, shape index: {}]   ;;  %s2237_s3 = inlined_call_operand.vmem [shape: f32[32,96], index: 3, kind: input, shape index: {}]   ;;  %s2238_s4 = inlined_call_operand.vmem [shape: f32[1,96], index: 4, kind: input, shape index: {}]   ;;  %s2239_s5 = inlined_call_operand.vmem [shape: f32[1,32], index: 5, kind: input, shape index: {}]   ;;  %s2240_s6 = inlined_call_operand.hbm [shape: f32[32,96], index: 6, kind: input, shape index: {}]   ;;  %s2241_s7 = inlined_call_operand.hbm [shape: f32[32,96], index: 7, kind: input, shape index: {}]   ;;  %s2242_s8 = inlined_call_operand.vmem [shape: f32[1,96], index: 8, kind: input, shape index: {}]   ;;  %s2243_s9 = inlined_call_operand.vmem [shape: f32[1,32], index: 9, kind: input, shape index: {}]   ;;  %s2244_s10 = inlined_call_operand.vmem [shape: f32[32,8], index: 10, kind: input, shape index: {}]   ;;  %s2245_s11 = inlined_call_operand.vmem [shape: f32[1,8], index: 11, kind: input, shape index: {}]   ;;  %s2246_s12 = inlined_call_operand.hbm [shape: f32[2,8], index: 12, kind: output, shape index: {0}]   ;;  %s2247_s13 = inlined_call_operand.hbm [shape: f32[2,2,32], index: 13, kind: output, shape index: {1}]  }
   0x1   :  { %20 = vsyncpa [#allocation6], 0 }
   0x2   :  { %21 = vsyncpa [#allocation4], 0 }
   0x3   :  { %22 = vsyncpa [#allocation9], 0  ;;  %s39_s27 = sshll.u32 %s2240_s6, 4  ;;  %s1746_s28 = smov [#allocation2]   ;;  %s40_s27 = int_to_ptr.hbm [resolvable:$true] %s39_s27 }
   0x4   :  { %s41_s29 = sshll.u32 %s1746_s28, 4  ;;  %s52_s15 = sshll.u32 %s2241_s7, 4  ;;  %s42_s29 = int_to_ptr.vmem [resolvable:$true] %s41_s29  ;;  %s53_s15 = int_to_ptr.hbm [resolvable:$true] %s52_s15 }
   0x5   :  { %s1747_s16 = smov 128   ;;  %s1748_s17 = smov 8  }
   0x6   :  { %47 = dma.hbm_to_vmem [thread:$0]  %s40_s27, 512, %s42_s29, [#allocation3], %s1747_s16, %s1747_s16, %s1748_s17  }
   0x7   :  { %s1749_s18 = smov [#allocation5]  }
   0x8   :  { %s54_s19 = sshll.u32 %s1749_s18, 4  ;;  %s55_s19 = int_to_ptr.vmem [resolvable:$true] %s54_s19 }
   0x9   :  { %60 = dma.hbm_to_vmem [thread:$0]  %s53_s15, 512, %s55_s19, [#allocation6], %s1747_s16, %s1747_s16, %s1748_s17  }
   0xa   :  { %1738 = dma.done.wait [#allocation3], 512  }
   0xb   :  { %1739 = vsyncadd [#allocation3], 4294966784 }
   0xc   :  { %1740 = dma.done.wait [#allocation6], 512  }
   0xd   :  { %1741 = vsyncadd [#allocation6], 4294966784  ;;  %vm113_vm0 = vcmask 1043456   ;;  %vm106_vm1 = vcmask 31744   ;;  %v1835_v0 = vld [vmem:[%s2237_s3 + $0x18] sm:$0xff]  ;;  %v1840_v1 = vld [vmem:[%s2237_s3 + $0x10] sm:$0xff] }
   0xe   :  { %v77_v2 = vld [vmem:[%s2236_s2] sm:$0xf]  ;;  %159 = vmatpush.msra.mxu1 %v1835_v0  ;;  %v1849_v3 = vld [vmem:[%s2237_s3 + $0x8] sm:$0xff]  ;;  %s1750_s14 = smov 32   ;;  %s1751_s17 = smov 64   ;;  %vm143_vm2 = vcmask 261120  }
   0xf   :  { %1484 = vmatpush.msk.msra.mxu0 %vm113_vm0, %v77_v2  ;;  %v101_v4 = vld [vmem:[%s2234_s0] sm:$0xff]  ;;  %v1896_v33 = vld [vmem:[#allocation5 + $0x18] sm:$0xff]  ;;  %v1898_v34 = vld [vmem:[#allocation5 + $0x10] sm:$0xff]  ;;  %s1753_s15 = smov [#allocation8]   ;;  %s1465_s18 = sshll.u32 %s2247_s13, 4  ;;  %s1466_s18 = int_to_ptr.hbm [resolvable:$true] %s1465_s18 }
  0x10   :  { %1485 = vmatmul.msk.f32.vlgmr.msra.gmra.mxu0 %vm106_vm1, %v101_v4  ;;  %v140_v5 = vld [vmem:[%s2235_s1] sm:$0x3]  ;;  %160 = vmatpush.msra.mxu1 %v1840_v1  ;;  %v1904_v36 = vld [vmem:[#allocation5 + $0x8] sm:$0xff]  ;;  %v1906_v37 = vld [vmem:[#allocation2 + $0x18] sm:$0xff]  ;;  %s1463_s16 = sshll.u32 %s1753_s15, 4  ;;  %s1755_s6 = smov [#allocation7]   ;;  %s1464_s16 = int_to_ptr.vmem [resolvable:$true] %s1463_s16 }
  0x11   :  { %v1539_v6 = vld [vmem:[%s2239_s5] ss:$0 sm:$0xff]  ;;  %208 = vrot.lane.b32.xlu2 %v140_v5, %s1750_s14  ;;  %476 = vmatpush.msrb.mxu0 %v1835_v0  ;;  %v1910_v38 = vld [vmem:[#allocation2 + $0x10] sm:$0xff]  ;;  %v1920_v40 = vld [vmem:[%s2235_s1 + $0x2] sm:$0x3]  ;;  %s1453_s20 = sshll.u32 %s1755_s6, 4  ;;  %s1454_s20 = int_to_ptr.vmem [resolvable:$true] %s1453_s20 }
  0x12   :  { %v1866_v7 = vld [vmem:[%s2237_s3] sm:$0xff]  ;;  %187 = vrot.lane.b32.xlu0 %v1539_v6, %s1751_s17  ;;  %161 = vmatpush.msra.mxu1 %v1849_v3  ;;  %v1922_v41 = vld [vmem:[#allocation2 + $0x8] sm:$0xff]  ;;  %s1455_s7 = sshll.u32 %s2246_s12, 4  ;;  %s1456_s7 = int_to_ptr.hbm [resolvable:$true] %s1455_s7 }
  0x13   :  { %477 = vmatpush.msrb.mxu0 %v1840_v1  ;;  %v1887_v11 = vld [vmem:[%s2238_s4] ss:$0 sm:$0xff]  ;;  %s1752_s4 = smov 96   ;;  %253 = vmatpush.msra.mxu3 %v1896_v33 }
  0x14   :  { %162 = vmatpush.msra.mxu1 %v1866_v7  ;;  %v1541_v35 = vld [vmem:[%s2243_s9] ss:$0 sm:$0xff]  ;;  %230 = vmatpush.msra.mxu2 %v1906_v37 }
  0x15   :  { %1488 = vmatmul.msk.f32.vlgmr.msra.gmra.mxu1 %vm143_vm2, %v140_v5  ;;  %478 = vmatpush.msrb.mxu0 %v1849_v3  ;;  %v1912_v39 = vld [vmem:[#allocation5] sm:$0xff] }
  0x16   :  { %319 = vmatpush.msrb.mxu1 %v1835_v0  ;;  %254 = vmatpush.msra.mxu3 %v1898_v34  ;;  %v1928_v42 = vld [vmem:[#allocation2] sm:$0xff] }
  0x17   :  { %479 = vmatpush.msrb.mxu0 %v1866_v7  ;;  %231 = vmatpush.msra.mxu2 %v1910_v38  ;;  %v1973_v56 = vld [vmem:[%s2242_s8] ss:$0 sm:$0xff] }
  0x18   :  { %320 = vmatpush.msrb.mxu1 %v1840_v1  ;;  %255 = vmatpush.msra.mxu3 %v1904_v36 }
  0x19   :  { %705 = vmatpush.msra.mxu0 %v1906_v37  ;;  %232 = vmatpush.msra.mxu2 %v1922_v41 }
  0x1a   :  { %321 = vmatpush.msrb.mxu1 %v1849_v3  ;;  %256 = vmatpush.msra.mxu3 %v1912_v39 }
  0x1b   :  { %706 = vmatpush.msra.mxu0 %v1910_v38  ;;  %1491 = vmatmul.msk.f32.vlgmr.msra.gmra.mxu3 %vm143_vm2, %v1920_v40 }
  0x1c   :  { %322 = vmatpush.msrb.mxu1 %v1866_v7  ;;  %416 = vmatpush.msrb.mxu3 %v1896_v33 }
  0x1d   :  { %233 = vmatpush.msra.mxu2 %v1928_v42  ;;  %707 = vmatpush.msra.mxu0 %v1922_v41 }
  0x1e   :  { %548 = vmatpush.msra.mxu1 %v1906_v37  ;;  %417 = vmatpush.msrb.mxu3 %v1898_v34 }
  0x1f   :  { %391 = vmatpush.msrb.mxu2 %v1906_v37  ;;  %708 = vmatpush.msra.mxu0 %v1928_v42 }
  0x20   :  { %549 = vmatpush.msra.mxu1 %v1910_v38  ;;  %418 = vmatpush.msrb.mxu3 %v1904_v36 }
  0x21   :  { %392 = vmatpush.msrb.mxu2 %v1910_v38 }
  0x22   :  { %550 = vmatpush.msra.mxu1 %v1922_v41  ;;  %419 = vmatpush.msrb.mxu3 %v1912_v39 }
  0x23   :  { %393 = vmatpush.msrb.mxu2 %v1922_v41 }
  0x24   :  { %551 = vmatpush.msra.mxu1 %v1928_v42  ;;  %633 = vmatpush.msra.mxu3 %v1835_v0 }
  0x25   :  { %394 = vmatpush.msrb.mxu2 %v1928_v42 }
  0x26   :  { %634 = vmatpush.msra.mxu3 %v1840_v1 }
  0x28   :  { %635 = vmatpush.msra.mxu3 %v1849_v3 }
  0x2a   :  { %636 = vmatpush.msra.mxu3 %v1866_v7 }
  0x6b   :  { %v209_v43 = vpop.permute.xlu2 %208 }
  0x84   :  { %v1880_v8 = vpop.permute.xlu0 %187 }
  0x8d   :  { %v134_v12 = vpop.f32.mrf.mxu0 }
  0x8e   :  { %v1890_v13 = vadd.f32 %v1887_v11, %v134_v12 }
  0x92   :  { %v164_v9 = vpop.f32.mrf.mxu1 }
  0x93   :  { %v190_v10 = vadd.f32 %v1880_v8, %v164_v9  ;;  %v167_v14 = vadd.f32 %v164_v9, %v1890_v13 }
  0x95   :  { %192 = vrot.lane.b32.xlu0 %v190_v10, %s1751_s17  ;;  %v1489_v15 = vmul.f32 -1.442695, %v167_v14 }
  0x97   :  { %1544 = vpow2.f32 %v1489_v15 }
  0x9d   :  { %v1545_v16 = vpop.eup %1544  ;;  %281 = vrot.lane.b32.xlu0 %v1541_v35, %s1751_s17 }
  0x9e   :  { %v171_v17 = vadd.f32 1.0, %v1545_v16  ;;  %v258_v51 = vpop.f32.mrf.mxu3 }
  0xa0   :  { %1546 = vrcp.f32 %v171_v17  ;;  %v183_v23 = vand.u32 2147483648, %v171_v17  ;;  %vm177_vm4 = vweird.f32 %v171_v17  ;;  %v181_v24 = vand.u32 2147483647, %v171_v17 }
  0xa2   :  { %v184_v26 = vor.u32 1.1754944e-38, %v183_v23  ;;  %vm182_vm6 = vcmp.eq.f32.partialorder %v181_v24, 8.507059e+37 }
  0xa6   :  { %v1547_v18 = vpop.eup %1546 }
  0xa7   :  { %v173_v19 = vmul.f32 %v1547_v18, %v171_v17  ;;  %vm178_vm3 = vweird.f32 %v1547_v18 }
  0xa8   :  { %vm179_vm5 = vmor %vm177_vm4, %vm178_vm3 }
  0xa9   :  { %v174_v20 = vsub.f32 1.0, %v173_v19 }
  0xab   :  { %v175_v21 = vmul.f32 %v1547_v18, %v174_v20 }
  0xad   :  { %v176_v22 = vadd.f32 %v1547_v18, %v175_v21 }
  0xaf   :  { %v180_v25 = vsel %vm179_vm5, %v1547_v18, %v176_v22 }
  0xb0   :  { %v185_v27 = vsel %vm182_vm6, %v184_v26, %v180_v25 }
  0xb1   :  { %v202_v44 = vsub.f32 1.0, %v185_v27  ;;  %v211_v46 = vmul.f32 %v209_v43, %v185_v27 }
 0x107   :  { %v193_v28 = vpop.permute.xlu0 %192 }
 0x108   :  { %v195_v29 = vmul.f32 %v193_v28, %v185_v27 }
 0x10a   :  { %197 = vrot.lane.b32.xlu1 %v195_v29, %s1751_s17 }
 0x10f   :  { %v1965_v50 = vpop.permute.xlu0 %281 }
 0x110   :  { %v284_v52 = vadd.f32 %v1965_v50, %v258_v51 }
 0x17c   :  { %v198_v30 = vpop.permute.xlu1 %197 }
 0x17d   :  { %v200_v31 = vadd.f32 %v198_v30, %v1890_v13 }
 0x17f   :  { %1548 = vtanh.f32 %v200_v31 }
 0x185   :  { %v1549_v32 = vpop.eup %1548 }
 0x186   :  { %204 = vrot.lane.b32.xlu1 %v1549_v32, %s1752_s4 }
 0x1f8   :  { %v205_v45 = vpop.permute.xlu1 %204 }
 0x1f9   :  { %v207_v47 = vmul.f32 %v205_v45, %v202_v44 }
 0x1fb   :  { %v1951_v48 = vadd.f32 %v211_v46, %v207_v47 }
 0x1fd   :  { %214 = vrot.lane.b32.xlu2 %v1951_v48, %s1752_s4 }
 0x205   :  { %286 = vrot.lane.b32.xlu2 %v284_v52, %s1751_s17 }
 0x257   :  { %v215_v49 = vpop.permute.xlu2 %214 }
 0x258   :  { %1490 = vmatmul.msk.f32.vlgmr.msra.gmra.mxu2 %vm143_vm2, %v215_v49  ;;  %1493 = vmatmul.msk.f32.vlgmr.msrb.gmra.mxu1 %vm143_vm2, %v215_v49 }
 0x259   :  { %573 = vmatpush.msra.mxu2 %v1896_v33  ;;  %730 = vmatpush.msrb.mxu1 %v1896_v33 }
 0x25b   :  { %574 = vmatpush.msra.mxu2 %v1898_v34  ;;  %731 = vmatpush.msrb.mxu1 %v1898_v34 }
 0x25d   :  { %575 = vmatpush.msra.mxu2 %v1904_v36  ;;  %732 = vmatpush.msrb.mxu1 %v1904_v36 }
 0x25f   :  { %576 = vmatpush.msra.mxu2 %v1912_v39  ;;  %733 = vmatpush.msrb.mxu1 %v1912_v39  ;;  %v287_v14 = vpop.permute.xlu2 %286 }
 0x2d5   :  { %v324_v53 = vpop.f32.mrf.mxu1 }
 0x2d6   :  { %v350_v54 = vadd.f32 %v324_v53, %v1880_v8  ;;  %v328_v18 = vrot.slane %v324_v53, 6 }
 0x2d8   :  { %v352_v55 = vrot.slane %v350_v54, 6  ;;  %v330_v19 = vadd.f32 %v328_v18, %v1890_v13 }
 0x2da   :  { %353 = vrot.lane.b32.xlu1 %v352_v55, %s1751_s17  ;;  %v1494_v20 = vmul.f32 -1.442695, %v330_v19 }
 0x2db   :  { %v235_v57 = vpop.f32.mrf.mxu2 }
 0x2dc   :  { %v236_v58 = vadd.f32 %v1973_v56, %v235_v57 }
 0x2de   :  { %v261_v59 = vadd.f32 %v258_v51, %v236_v58 }
 0x2e0   :  { %v1492_v60 = vmul.f32 -1.442695, %v261_v59 }
 0x2e2   :  { %1550 = vpow2.f32 %v1492_v60 }
 0x2e8   :  { %v1551_v61 = vpop.eup %1550 }
 0x2e9   :  { %v265_v62 = vadd.f32 1.0, %v1551_v61 }
 0x2eb   :  { %1552 = vrcp.f32 %v265_v62  ;;  %v277_v5 = vand.u32 2147483648, %v265_v62  ;;  %v275_v9 = vand.u32 2147483647, %v265_v62  ;;  %vm271_vm8 = vweird.f32 %v265_v62 }
 0x2ec   :  { %1554 = vpow2.f32 %v1494_v20 }
 0x2ed   :  { %v278_v12 = vor.u32 1.1754944e-38, %v277_v5  ;;  %vm276_vm10 = vcmp.eq.f32.partialorder %v275_v9, 8.507059e+37 }
 0x2f1   :  { %v1553_v63 = vpop.eup %1552 }
 0x2f2   :  { %v267_v2 = vmul.f32 %v1553_v63, %v265_v62  ;;  %vm272_vm7 = vweird.f32 %v1553_v63  ;;  %v1555_v21 = vpop.eup %1554 }
 0x2f3   :  { %vm273_vm9 = vmor %vm271_vm8, %vm272_vm7  ;;  %v334_v22 = vadd.f32 1.0, %v1555_v21 }
 0x2f4   :  { %v268_v4 = vsub.f32 1.0, %v267_v2 }
 0x2f5   :  { %1556 = vrcp.f32 %v334_v22  ;;  %v346_v28 = vand.u32 2147483648, %v334_v22  ;;  %vm340_vm12 = vweird.f32 %v334_v22  ;;  %v344_v29 = vand.u32 2147483647, %v334_v22 }
 0x2f6   :  { %v269_v6 = vmul.f32 %v1553_v63, %v268_v4  ;;  %v102_v4 = vld [vmem:[%s2234_s0 + $0x8] sm:$0xff] }
 0x2f7   :  { %v347_v31 = vor.u32 1.1754944e-38, %v346_v28  ;;  %vm345_vm14 = vcmp.eq.f32.partialorder %v344_v29, 8.507059e+37  ;;  %1486 = vmatmul.msk.f32.gmra.mxu0 %vm106_vm1, %v102_v4 }
 0x2f8   :  { %v270_v10 = vadd.f32 %v1553_v63, %v269_v6 }
 0x2fa   :  { %v274_v15 = vsel %vm273_vm9, %v1553_v63, %v270_v10 }
 0x2fb   :  { %v279_v16 = vsel %vm276_vm10, %v278_v12, %v274_v15  ;;  %v1557_v23 = vpop.eup %1556 }
 0x2fc   :  { %v289_v17 = vmul.f32 %v287_v14, %v279_v16  ;;  %v336_v24 = vmul.f32 %v1557_v23, %v334_v22  ;;  %vm341_vm11 = vweird.f32 %v1557_v23  ;;  %v296_v52 = vsub.f32 1.0, %v279_v16 }
 0x2fd   :  { %vm342_vm13 = vmor %vm340_vm12, %vm341_vm11 }
 0x2fe   :  { %291 = vrot.lane.b32.xlu1 %v289_v17, %s1751_s17  ;;  %v337_v25 = vsub.f32 1.0, %v336_v24 }
 0x300   :  { %v338_v26 = vmul.f32 %v1557_v23, %v337_v25 }
 0x302   :  { %v339_v27 = vadd.f32 %v1557_v23, %v338_v26 }
 0x304   :  { %v343_v30 = vsel %vm342_vm13, %v1557_v23, %v339_v27 }
 0x305   :  { %v348_v35 = vsel %vm345_vm14, %v347_v31, %v343_v30 }
 0x306   :  { %302 = vrot.lane.b32.xlu1 %v1920_v40, %s1750_s14  ;;  %v363_v59 = vsub.f32 1.0, %v348_v35 }
 0x34c   :  { %v354_v32 = vpop.permute.xlu1 %353 }
 0x34d   :  { %v356_v40 = vmul.f32 %v354_v32, %v348_v35 }
 0x34f   :  { %358 = vrot.lane.b32.xlu0 %v356_v40, %s1751_s17 }
 0x370   :  { %v292_v43 = vpop.permute.xlu1 %291 }
 0x371   :  { %v294_v44 = vadd.f32 %v292_v43, %v236_v58  ;;  %v369_v58 = vrot.slane %v1951_v48, 6 }
 0x373   :  { %1558 = vtanh.f32 %v294_v44  ;;  %v371_v62 = vmul.f32 %v369_v58, %v348_v35 }
 0x374   :  { %v2015_v10 = vpop.f32.mrf.mxu0 }
 0x378   :  { %v303_v51 = vpop.permute.xlu1 %302 }
 0x379   :  { %v1559_v45 = vpop.eup %1558  ;;  %v305_v54 = vmul.f32 %v303_v51, %v279_v16 }
 0x37a   :  { %298 = vrot.lane.b32.xlu0 %v1559_v45, %s1752_s4 }
 0x3c1   :  { %v359_v46 = vpop.permute.xlu0 %358 }
 0x3c2   :  { %v361_v47 = vadd.f32 %v359_v46, %v1890_v13 }
 0x3c4   :  { %1560 = vtanh.f32 %v361_v47 }
 0x3ca   :  { %v1561_v49 = vpop.eup %1560 }
 0x3cb   :  { %365 = vrot.lane.b32.xlu2 %v1561_v49, %s1752_s4 }
 0x3ec   :  { %v299_v53 = vpop.permute.xlu0 %298 }
 0x3ed   :  { %v301_v55 = vmul.f32 %v299_v53, %v296_v52 }
 0x3ef   :  { %v1985_v57 = vadd.f32 %v305_v54, %v301_v55 }
 0x3f1   :  { %400 = vrot.lane.b32.xlu0 %v1985_v57, %s1752_s4 }
 0x425   :  { %v366_v60 = vpop.permute.xlu2 %365 }
 0x426   :  { %v368_v61 = vmul.f32 %v366_v60, %v363_v59 }
 0x428   :  { %v1990_v63 = vadd.f32 %v371_v62, %v368_v61 }
 0x42a   :  { %v374_v2 = vrot.slane %v1990_v63, 2 }
 0x42c   :  { %375 = vrot.lane.b32.xlu2 %v374_v2, %s1752_s4 }
 0x463   :  { %v401_v5 = vpop.permute.xlu0 %400 }
 0x464   :  { %1496 = vmatmul.msk.f32.vlgmr.msrb.gmra.mxu3 %vm143_vm2, %v401_v5 }
 0x465   :  { %856 = vmatpush.msrb.mxu3 %v1906_v37 }
 0x467   :  { %857 = vmatpush.msrb.mxu3 %v1910_v38 }
 0x469   :  { %858 = vmatpush.msrb.mxu3 %v1922_v41 }
 0x46b   :  { %859 = vmatpush.msrb.mxu3 %v1928_v42 }
 0x486   :  { %v376_v48 = vpop.permute.xlu2 %375 }
 0x487   :  { %1495 = vmatmul.msk.f32.vlgmr.msrb.gmra.mxu2 %vm143_vm2, %v376_v48  ;;  %1498 = vmatmul.msk.f32.vlgmr.msrb.gmra.mxu0 %vm143_vm2, %v376_v48 }
 0x488   :  { %790 = vmatpush.msrb.mxu2 %v1835_v0  ;;  %881 = vmatpush.msrb.mxu0 %v1896_v33 }
 0x48a   :  { %791 = vmatpush.msrb.mxu2 %v1840_v1  ;;  %882 = vmatpush.msrb.mxu0 %v1898_v34 }
 0x48c   :  { %792 = vmatpush.msrb.mxu2 %v1849_v3  ;;  %883 = vmatpush.msrb.mxu0 %v1904_v36 }
 0x48e   :  { %793 = vmatpush.msrb.mxu2 %v1866_v7  ;;  %884 = vmatpush.msrb.mxu0 %v1912_v39 }
 0x4e7   :  { %v421_v6 = vpop.f32.mrf.mxu3 }
 0x4e8   :  { %v444_v9 = vadd.f32 %v421_v6, %v1965_v50 }
 0x4ea   :  { %446 = vrot.lane.b32.xlu2 %v444_v9, %s1751_s17 }
 0x504   :  { %v481_v12 = vpop.f32.mrf.mxu0 }
 0x505   :  { %v507_v14 = vadd.f32 %v481_v12, %v1880_v8  ;;  %v485_v40 = vrot.slane %v481_v12, 4 }
 0x507   :  { %v509_v15 = vrot.slane %v507_v14, 4  ;;  %v487_v43 = vadd.f32 %v485_v40, %v1890_v13 }
 0x509   :  { %510 = vrot.lane.b32.xlu1 %v509_v15, %s1751_s17  ;;  %v1499_v44 = vmul.f32 -1.442695, %v487_v43 }
 0x50a   :  { %v396_v16 = vpop.f32.mrf.mxu2 }
 0x50b   :  { %v397_v17 = vadd.f32 %v1973_v56, %v396_v16 }
 0x50d   :  { %v424_v18 = vadd.f32 %v421_v6, %v397_v17 }
 0x50f   :  { %v1497_v19 = vmul.f32 -1.442695, %v424_v18 }
 0x511   :  { %1562 = vpow2.f32 %v1497_v19 }
 0x517   :  { %v1563_v20 = vpop.eup %1562 }
 0x518   :  { %v428_v21 = vadd.f32 1.0, %v1563_v20 }
 0x51a   :  { %1564 = vrcp.f32 %v428_v21  ;;  %v440_v27 = vand.u32 2147483648, %v428_v21  ;;  %vm434_vm0 = vweird.f32 %v428_v21  ;;  %v438_v28 = vand.u32 2147483647, %v428_v21 }
 0x51b   :  { %1566 = vpow2.f32 %v1499_v44 }
 0x51c   :  { %v441_v30 = vor.u32 1.1754944e-38, %v440_v27  ;;  %vm439_vm3 = vcmp.eq.f32.partialorder %v438_v28, 8.507059e+37 }
 0x520   :  { %v1565_v22 = vpop.eup %1564 }
 0x521   :  { %v430_v23 = vmul.f32 %v1565_v22, %v428_v21  ;;  %vm435_vm15 = vweird.f32 %v1565_v22  ;;  %v1567_v45 = vpop.eup %1566 }
 0x522   :  { %vm436_vm1 = vmor %vm434_vm0, %vm435_vm15  ;;  %v491_v46 = vadd.f32 1.0, %v1567_v45 }
 0x523   :  { %v431_v24 = vsub.f32 1.0, %v430_v23 }
 0x524   :  { %1568 = vrcp.f32 %v491_v46  ;;  %v503_v54 = vand.u32 2147483648, %v491_v46  ;;  %vm497_vm5 = vweird.f32 %v491_v46  ;;  %v501_v55 = vand.u32 2147483647, %v491_v46 }
 0x525   :  { %v432_v25 = vmul.f32 %v1565_v22, %v431_v24 }
 0x526   :  { %v504_v59 = vor.u32 1.1754944e-38, %v503_v54  ;;  %vm502_vm7 = vcmp.eq.f32.partialorder %v501_v55, 8.507059e+37 }
 0x527   :  { %v433_v26 = vadd.f32 %v1565_v22, %v432_v25 }
 0x529   :  { %v437_v29 = vsel %vm436_vm1, %v1565_v22, %v433_v26 }
 0x52a   :  { %v442_v31 = vsel %vm439_vm3, %v441_v30, %v437_v29  ;;  %v1569_v47 = vpop.eup %1568 }
 0x52b   :  { %v493_v49 = vmul.f32 %v1569_v47, %v491_v46  ;;  %vm498_vm4 = vweird.f32 %v1569_v47  ;;  %v456_v12 = vsub.f32 1.0, %v442_v31  ;;  %v462_v15 = vmul.f32 %v442_v31, %v1985_v57 }
 0x52c   :  { %vm499_vm6 = vmor %vm497_vm5, %vm498_vm4 }
 0x52d   :  { %v494_v51 = vsub.f32 1.0, %v493_v49 }
 0x52f   :  { %v495_v52 = vmul.f32 %v1569_v47, %v494_v51 }
 0x531   :  { %v496_v53 = vadd.f32 %v1569_v47, %v495_v52 }
 0x533   :  { %v500_v58 = vsel %vm499_vm6, %v1569_v47, %v496_v53 }
 0x534   :  { %v505_v61 = vsel %vm502_vm7, %v504_v59, %v500_v58 }
 0x535   :  { %v520_v19 = vsub.f32 1.0, %v505_v61 }
 0x544   :  { %v447_v32 = vpop.permute.xlu2 %446 }
 0x545   :  { %v449_v35 = vmul.f32 %v447_v32, %v442_v31 }
 0x547   :  { %451 = vrot.lane.b32.xlu1 %v449_v35, %s1751_s17 }
 0x57b   :  { %v511_v60 = vpop.permute.xlu1 %510 }
 0x57c   :  { %v513_v62 = vmul.f32 %v511_v60, %v505_v61 }
 0x57e   :  { %515 = vrot.lane.b32.xlu0 %v513_v62, %s1751_s17 }
 0x5b9   :  { %v452_v2 = vpop.permute.xlu1 %451 }
 0x5ba   :  { %v454_v4 = vadd.f32 %v452_v2, %v397_v17  ;;  %v526_v17 = vrot.slane %v1990_v63, 6 }
 0x5bc   :  { %1570 = vtanh.f32 %v454_v4  ;;  %v528_v21 = vmul.f32 %v526_v17, %v505_v61 }
 0x5c2   :  { %v1571_v5 = vpop.eup %1570 }
 0x5c3   :  { %458 = vrot.lane.b32.xlu0 %v1571_v5, %s1752_s4 }
 0x5f0   :  { %v516_v48 = vpop.permute.xlu0 %515 }
 0x5f1   :  { %v518_v6 = vadd.f32 %v516_v48, %v1890_v13 }
 0x5f3   :  { %1572 = vtanh.f32 %v518_v6 }
 0x5f9   :  { %v1573_v9 = vpop.eup %1572 }
 0x5fa   :  { %522 = vrot.lane.b32.xlu2 %v1573_v9, %s1752_s4 }
 0x635   :  { %v459_v14 = vpop.permute.xlu0 %458 }
 0x636   :  { %v461_v16 = vmul.f32 %v459_v14, %v456_v12 }
 0x638   :  { %v2027_v18 = vadd.f32 %v462_v15, %v461_v16 }
 0x63a   :  { %557 = vrot.lane.b32.xlu2 %v2027_v18, %s1752_s4 }
 0x654   :  { %v523_v20 = vpop.permute.xlu2 %522 }
 0x655   :  { %v525_v22 = vmul.f32 %v523_v20, %v520_v19 }
 0x657   :  { %v2032_v23 = vadd.f32 %v528_v21, %v525_v22 }
 0x659   :  { %v531_v24 = vrot.slane %v2032_v23, 4 }
 0x65b   :  { %532 = vrot.lane.b32.xlu1 %v531_v24, %s1752_s4 }
 0x694   :  { %v558_v25 = vpop.permute.xlu2 %557 }
 0x695   :  { %1501 = vmatmul.msk.f32.vlgmr.msra.gmra.mxu2 %vm143_vm2, %v558_v25 }
 0x696   :  { %1013 = vmatpush.msra.mxu2 %v1906_v37 }
 0x698   :  { %1014 = vmatpush.msra.mxu2 %v1910_v38 }
 0x69a   :  { %1015 = vmatpush.msra.mxu2 %v1922_v41 }
 0x69c   :  { %1016 = vmatpush.msra.mxu2 %v1928_v42 }
 0x6cd   :  { %v533_v57 = vpop.permute.xlu1 %532 }
 0x6ce   :  { %1500 = vmatmul.msk.f32.vlgmr.msra.gmra.mxu1 %vm143_vm2, %v533_v57  ;;  %1503 = vmatmul.msk.f32.vlgmr.msra.gmra.mxu3 %vm143_vm2, %v533_v57 }
 0x6cf   :  { %941 = vmatpush.msra.mxu1 %v1835_v0  ;;  %1038 = vmatpush.msra.mxu3 %v1896_v33 }
 0x6d1   :  { %942 = vmatpush.msra.mxu1 %v1840_v1  ;;  %1039 = vmatpush.msra.mxu3 %v1898_v34 }
 0x6d3   :  { %943 = vmatpush.msra.mxu1 %v1849_v3  ;;  %1040 = vmatpush.msra.mxu3 %v1904_v36 }
 0x6d5   :  { %944 = vmatpush.msra.mxu1 %v1866_v7  ;;  %1041 = vmatpush.msra.mxu3 %v1912_v39 }
 0x718   :  { %v578_v63 = vpop.f32.mrf.mxu2 }
 0x719   :  { %v601_v26 = vadd.f32 %v578_v63, %v1965_v50 }
 0x71b   :  { %603 = vrot.lane.b32.xlu1 %v601_v26, %s1751_s17 }
 0x74b   :  { %v553_v30 = vpop.f32.mrf.mxu1 }
 0x74c   :  { %v554_v31 = vadd.f32 %v1973_v56, %v553_v30 }
 0x74e   :  { %v581_v32 = vadd.f32 %v578_v63, %v554_v31 }
 0x750   :  { %v1502_v35 = vmul.f32 -1.442695, %v581_v32 }
 0x751   :  { %v638_v27 = vpop.f32.mrf.mxu3 }
 0x752   :  { %v664_v28 = vadd.f32 %v638_v27, %v1880_v8  ;;  %1574 = vpow2.f32 %v1502_v35  ;;  %v642_v60 = vrot.slane %v638_v27, 2 }
 0x754   :  { %v666_v29 = vrot.slane %v664_v28, 2  ;;  %v644_v61 = vadd.f32 %v642_v60, %v1890_v13 }
 0x756   :  { %667 = vrot.lane.b32.xlu0 %v666_v29, %s1751_s17  ;;  %v1504_v62 = vmul.f32 -1.442695, %v644_v61 }
 0x758   :  { %v1575_v40 = vpop.eup %1574 }
 0x759   :  { %v585_v43 = vadd.f32 1.0, %v1575_v40 }
 0x75b   :  { %1576 = vrcp.f32 %v585_v43  ;;  %v597_v51 = vand.u32 2147483648, %v585_v43  ;;  %vm591_vm9 = vweird.f32 %v585_v43  ;;  %v595_v52 = vand.u32 2147483647, %v585_v43 }
 0x75c   :  { %1578 = vpow2.f32 %v1504_v62 }
 0x75d   :  { %v598_v54 = vor.u32 1.1754944e-38, %v597_v51  ;;  %vm596_vm11 = vcmp.eq.f32.partialorder %v595_v52, 8.507059e+37 }
 0x761   :  { %v1577_v44 = vpop.eup %1576 }
 0x762   :  { %v587_v45 = vmul.f32 %v1577_v44, %v585_v43  ;;  %vm592_vm8 = vweird.f32 %v1577_v44  ;;  %v1579_v2 = vpop.eup %1578 }
 0x763   :  { %vm593_vm10 = vmor %vm591_vm9, %vm592_vm8  ;;  %v648_v4 = vadd.f32 1.0, %v1579_v2 }
 0x764   :  { %v588_v46 = vsub.f32 1.0, %v587_v45 }
 0x765   :  { %1580 = vrcp.f32 %v648_v4  ;;  %v660_v14 = vand.u32 2147483648, %v648_v4  ;;  %vm654_vm13 = vweird.f32 %v648_v4  ;;  %v658_v15 = vand.u32 2147483647, %v648_v4 }
 0x766   :  { %v589_v47 = vmul.f32 %v1577_v44, %v588_v46 }
 0x767   :  { %v661_v17 = vor.u32 1.1754944e-38, %v660_v14  ;;  %vm659_vm15 = vcmp.eq.f32.partialorder %v658_v15, 8.507059e+37  ;;  %v2097_v15 = vadd.f32 %v1887_v11, %v2015_v10 }
 0x768   :  { %v590_v49 = vadd.f32 %v1577_v44, %v589_v47 }
 0x76a   :  { %v594_v53 = vsel %vm593_vm10, %v1577_v44, %v590_v49 }
 0x76b   :  { %v599_v58 = vsel %vm596_vm11, %v598_v54, %v594_v53  ;;  %v1581_v5 = vpop.eup %1580 }
 0x76c   :  { %v650_v48 = vmul.f32 %v1581_v5, %v648_v4  ;;  %vm655_vm12 = vweird.f32 %v1581_v5  ;;  %v613_v27 = vsub.f32 1.0, %v599_v58  ;;  %v619_v29 = vmul.f32 %v599_v58, %v2027_v18 }
 0x76d   :  { %vm656_vm14 = vmor %vm654_vm13, %vm655_vm12 }
 0x76e   :  { %v651_v6 = vsub.f32 1.0, %v650_v48 }
 0x770   :  { %v652_v9 = vmul.f32 %v1581_v5, %v651_v6 }
 0x772   :  { %v653_v12 = vadd.f32 %v1581_v5, %v652_v9 }
 0x774   :  { %v657_v16 = vsel %vm656_vm14, %v1581_v5, %v653_v12 }
 0x775   :  { %v662_v20 = vsel %vm659_vm15, %v661_v17, %v657_v16 }
 0x776   :  { %v677_v35 = vsub.f32 1.0, %v662_v20 }
 0x78d   :  { %v604_v55 = vpop.permute.xlu1 %603 }
 0x78e   :  { %v606_v59 = vmul.f32 %v604_v55, %v599_v58 }
 0x790   :  { %608 = vrot.lane.b32.xlu0 %v606_v59, %s1751_s17 }
 0x7c8   :  { %v668_v19 = vpop.permute.xlu0 %667 }
 0x7c9   :  { %v670_v21 = vmul.f32 %v668_v19, %v662_v20 }
 0x7cb   :  { %672 = vrot.lane.b32.xlu2 %v670_v21, %s1751_s17 }
 0x802   :  { %v609_v22 = vpop.permute.xlu0 %608 }
 0x803   :  { %v611_v24 = vadd.f32 %v609_v22, %v554_v31  ;;  %v683_v31 = vrot.slane %v2032_v23, 6 }
 0x805   :  { %1582 = vtanh.f32 %v611_v24  ;;  %v685_v43 = vmul.f32 %v683_v31, %v662_v20 }
 0x80b   :  { %v1583_v25 = vpop.eup %1582 }
 0x80c   :  { %615 = vrot.lane.b32.xlu2 %v1583_v25, %s1752_s4 }
 0x825   :  { %v673_v57 = vpop.permute.xlu2 %672 }
 0x826   :  { %v675_v63 = vadd.f32 %v673_v57, %v1890_v13 }
 0x828   :  { %1584 = vtanh.f32 %v675_v63 }
 0x82e   :  { %v1585_v26 = vpop.eup %1584 }
 0x82f   :  { %679 = vrot.lane.b32.xlu1 %v1585_v26, %s1752_s4 }
 0x866   :  { %v616_v28 = vpop.permute.xlu2 %615 }
 0x867   :  { %v618_v30 = vmul.f32 %v616_v28, %v613_v27 }
 0x869   :  { %v2063_v32 = vadd.f32 %v619_v29, %v618_v30 }
 0x86b   :  { %714 = vrot.lane.b32.xlu1 %v2063_v32, %s1752_s4 }
 0x8a1   :  { %v680_v40 = vpop.permute.xlu1 %679 }
 0x8a2   :  { %v682_v13 = vmul.f32 %v680_v40, %v677_v35 }
 0x8a4   :  { %v2068_v44 = vadd.f32 %v685_v43, %v682_v13 }
 0x8a6   :  { %v688_v45 = vrot.slane %v2068_v44, 6  ;;  %v1640_v44 = vld [vmem:[%s2237_s3 + $0x10] sm:$0xff] }
 0x8a8   :  { %689 = vrot.lane.b32.xlu0 %v688_v45, %s1752_s4 }
 0x8dd   :  { %v715_v18 = vpop.permute.xlu1 %714 }
 0x8de   :  { %1506 = vmatmul.msk.f32.vlgmr.msrb.gmra.mxu1 %vm143_vm2, %v715_v18 }
 0x8df   :  { %1170 = vmatpush.msrb.mxu1 %v1906_v37 }
 0x8e1   :  { %1171 = vmatpush.msrb.mxu1 %v1910_v38 }
 0x8e3   :  { %1172 = vmatpush.msrb.mxu1 %v1922_v41 }
 0x8e5   :  { %1173 = vmatpush.msrb.mxu1 %v1928_v42 }
 0x91a   :  { %v690_v23 = vpop.permute.xlu0 %689 }
 0x91b   :  { %1505 = vmatmul.msk.f32.vlgmr.msra.gmra.mxu0 %vm143_vm2, %v690_v23  ;;  %1508 = vmatmul.msk.f32.vlgmr.msrb.gmra.mxu2 %vm143_vm2, %v690_v23 }
 0x91c   :  { %1098 = vmatpush.msra.mxu0 %v1835_v0  ;;  %1195 = vmatpush.msrb.mxu2 %v1896_v33 }
 0x91e   :  { %1099 = vmatpush.msra.mxu0 %v1840_v1  ;;  %1196 = vmatpush.msrb.mxu2 %v1898_v34 }
 0x920   :  { %1100 = vmatpush.msra.mxu0 %v1849_v3  ;;  %1197 = vmatpush.msrb.mxu2 %v1904_v36 }
 0x922   :  { %1101 = vmatpush.msra.mxu0 %v1866_v7  ;;  %1198 = vmatpush.msrb.mxu2 %v1912_v39 }
 0x95b   :  { %v735_v46 = vpop.f32.mrf.mxu1 }
 0x95c   :  { %v758_v47 = vadd.f32 %v735_v46, %v1965_v50 }
 0x95e   :  { %760 = vrot.lane.b32.xlu2 %v758_v47, %s1751_s17 }
 0x998   :  { %v710_v49 = vpop.f32.mrf.mxu0 }
 0x999   :  { %v711_v51 = vadd.f32 %v1973_v56, %v710_v49 }
 0x99b   :  { %v738_v52 = vadd.f32 %v735_v46, %v711_v51 }
 0x99d   :  { %v1507_v1 = vmul.f32 -1.442695, %v738_v52 }
 0x99e   :  { %v795_v53 = vpop.f32.mrf.mxu2 }
 0x99f   :  { %1586 = vpow2.f32 %v1507_v1  ;;  %v818_v54 = vadd.f32 %v795_v53, %v1880_v8  ;;  %v798_v16 = vadd.f32 %v795_v53, %v2097_v15 }
 0x9a1   :  { %820 = vrot.lane.b32.xlu0 %v818_v54, %s1751_s17  ;;  %v1509_v17 = vmul.f32 -1.442695, %v798_v16 }
 0x9a5   :  { %v1587_v55 = vpop.eup %1586 }
 0x9a6   :  { %v742_v58 = vadd.f32 1.0, %v1587_v55 }
 0x9a8   :  { %1588 = vrcp.f32 %v742_v58  ;;  %v754_v62 = vand.u32 2147483648, %v742_v58  ;;  %v752_v4 = vand.u32 2147483647, %v742_v58  ;;  %vm748_vm1 = vweird.f32 %v742_v58 }
 0x9a9   :  { %1590 = vpow2.f32 %v1509_v17 }
 0x9aa   :  { %v755_v48 = vor.u32 1.1754944e-38, %v754_v62  ;;  %vm753_vm4 = vcmp.eq.f32.partialorder %v752_v4, 8.507059e+37 }
 0x9ae   :  { %v1589_v59 = vpop.eup %1588 }
 0x9af   :  { %v744_v60 = vmul.f32 %v1589_v59, %v742_v58  ;;  %vm749_vm0 = vweird.f32 %v1589_v59  ;;  %v1591_v19 = vpop.eup %1590 }
 0x9b0   :  { %vm750_vm3 = vmor %vm748_vm1, %vm749_vm0  ;;  %v802_v20 = vadd.f32 1.0, %v1591_v19 }
 0x9b1   :  { %v745_v61 = vsub.f32 1.0, %v744_v60 }
 0x9b2   :  { %1592 = vrcp.f32 %v802_v20  ;;  %v814_v63 = vand.u32 2147483648, %v802_v20  ;;  %vm808_vm6 = vweird.f32 %v802_v20  ;;  %v812_v26 = vand.u32 2147483647, %v802_v20 }
 0x9b3   :  { %v746_v2 = vmul.f32 %v1589_v59, %v745_v61 }
 0x9b4   :  { %v815_v11 = vor.u32 1.1754944e-38, %v814_v63  ;;  %vm813_vm8 = vcmp.eq.f32.partialorder %v812_v26, 8.507059e+37 }
 0x9b5   :  { %v747_v5 = vadd.f32 %v1589_v59, %v746_v2 }
 0x9b7   :  { %v751_v6 = vsel %vm750_vm3, %v1589_v59, %v747_v5 }
 0x9b8   :  { %v761_v9 = vpop.permute.xlu2 %760  ;;  %v756_v12 = vsel %vm753_vm4, %v755_v48, %v751_v6  ;;  %v1593_v21 = vpop.eup %1592 }
 0x9b9   :  { %v763_v14 = vmul.f32 %v761_v9, %v756_v12  ;;  %v804_v22 = vmul.f32 %v1593_v21, %v802_v20  ;;  %vm809_vm5 = vweird.f32 %v1593_v21  ;;  %v770_v18 = vsub.f32 1.0, %v756_v12 }
 0x9ba   :  { %vm810_vm7 = vmor %vm808_vm6, %vm809_vm5  ;;  %v776_v46 = vmul.f32 %v756_v12, %v2063_v32 }
 0x9bb   :  { %765 = vrot.lane.b32.xlu1 %v763_v14, %s1751_s17  ;;  %v805_v24 = vsub.f32 1.0, %v804_v22 }
 0x9bd   :  { %v806_v25 = vmul.f32 %v1593_v21, %v805_v24 }
 0x9bf   :  { %v807_v57 = vadd.f32 %v1593_v21, %v806_v25 }
 0x9c1   :  { %v811_v27 = vsel %vm810_vm7, %v1593_v21, %v807_v57 }
 0x9c2   :  { %v816_v28 = vsel %vm813_vm8, %v815_v11, %v811_v27 }
 0x9c3   :  { %v837_v1 = vmul.f32 %v816_v28, %v688_v45 }
 0xa13   :  { %v821_v10 = vpop.permute.xlu0 %820 }
 0xa14   :  { %v823_v29 = vmul.f32 %v821_v10, %v816_v28 }
 0xa16   :  { %825 = vrot.lane.b32.xlu2 %v823_v29, %s1751_s17 }
 0xa2d   :  { %v766_v30 = vpop.permute.xlu1 %765 }
 0xa2e   :  { %v768_v31 = vadd.f32 %v766_v30, %v711_v51  ;;  %v830_v51 = vsub.f32 1.0, %v816_v28 }
 0xa30   :  { %1594 = vtanh.f32 %v768_v31 }
 0xa36   :  { %v1595_v35 = vpop.eup %1594 }
 0xa37   :  { %772 = vrot.lane.b32.xlu0 %v1595_v35, %s1752_s4 }
 0xa70   :  { %v826_v40 = vpop.permute.xlu2 %825 }
 0xa71   :  { %v828_v43 = vadd.f32 %v826_v40, %v2097_v15 }
 0xa73   :  { %1596 = vtanh.f32 %v828_v43 }
 0xa79   :  { %v1597_v13 = vpop.eup %1596 }
 0xa7a   :  { %832 = vrot.lane.b32.xlu1 %v1597_v13, %s1752_s4 }
 0xaa9   :  { %v773_v23 = vpop.permute.xlu0 %772 }
 0xaaa   :  { %v775_v47 = vmul.f32 %v773_v23, %v770_v18 }
 0xaac   :  { %v2105_v49 = vadd.f32 %v776_v46, %v775_v47 }
 0xaae   :  { %865 = vrot.lane.b32.xlu2 %v2105_v49, %s1752_s4 }
 0xaec   :  { %v833_v52 = vpop.permute.xlu1 %832 }
 0xaed   :  { %v835_v53 = vmul.f32 %v833_v52, %v830_v51 }
 0xaef   :  { %v2111_v54 = vadd.f32 %v837_v1, %v835_v53 }
 0xaf1   :  { %840 = vrot.lane.b32.xlu0 %v2111_v54, %s1752_s4  ;;  %v991_v17 = vrot.slane %v2111_v54, 6 }
 0xb08   :  { %v866_v55 = vpop.permute.xlu2 %865 }
 0xb09   :  { %1511 = vmatmul.msk.f32.vlgmr.msrb.gmra.mxu0 %vm143_vm2, %v866_v55 }
 0xb0a   :  { %1327 = vmatpush.msrb.mxu0 %v1906_v37 }
 0xb0c   :  { %1328 = vmatpush.msrb.mxu0 %v1910_v38 }
 0xb0e   :  { %1329 = vmatpush.msrb.mxu0 %v1922_v41 }
 0xb10   :  { %1330 = vmatpush.msrb.mxu0 %v1928_v42 }
 0xb63   :  { %v841_v32 = vpop.permute.xlu0 %840 }
 0xb64   :  { %1510 = vmatmul.msk.f32.vlgmr.msrb.gmra.mxu3 %vm143_vm2, %v841_v32  ;;  %1513 = vmatmul.msk.f32.vlgmr.msra.gmra.mxu1 %vm143_vm2, %v841_v32 }
 0xb65   :  { %1255 = vmatpush.msrb.mxu3 %v1835_v0  ;;  %1352 = vmatpush.msra.mxu1 %v1896_v33 }
 0xb67   :  { %1256 = vmatpush.msrb.mxu3 %v1640_v44  ;;  %1353 = vmatpush.msra.mxu1 %v1898_v34 }
 0xb69   :  { %1257 = vmatpush.msrb.mxu3 %v1849_v3  ;;  %1354 = vmatpush.msra.mxu1 %v1904_v36 }
 0xb6b   :  { %1258 = vmatpush.msrb.mxu3 %v1866_v7  ;;  %1355 = vmatpush.msra.mxu1 %v1912_v39 }
 0xb86   :  { %v886_v37 = vpop.f32.mrf.mxu0 }
 0xb87   :  { %v909_v0 = vadd.f32 %v886_v37, %v1965_v50 }
 0xb89   :  { %911 = vrot.lane.b32.xlu1 %v909_v0, %s1751_s17 }
 0xbe1   :  { %v946_v33 = vpop.f32.mrf.mxu1 }
 0xbe2   :  { %v950_v38 = vrot.slane %v946_v33, 6  ;;  %v972_v41 = vadd.f32 %v946_v33, %v1880_v8 }
 0xbe4   :  { %v952_v42 = vadd.f32 %v950_v38, %v2097_v15  ;;  %v974_v34 = vrot.slane %v972_v41, 6 }
 0xbe6   :  { %v1514_v45 = vmul.f32 -1.442695, %v952_v42  ;;  %975 = vrot.lane.b32.xlu2 %v974_v34, %s1751_s17 }
 0xbe7   :  { %v861_v3 = vpop.f32.mrf.mxu3 }
 0xbe8   :  { %1598 = vpow2.f32 %v1514_v45  ;;  %v862_v7 = vadd.f32 %v1973_v56, %v861_v3 }
 0xbea   :  { %v889_v36 = vadd.f32 %v886_v37, %v862_v7 }
 0xbec   :  { %v1512_v39 = vmul.f32 -1.442695, %v889_v36 }
 0xbee   :  { %v1599_v58 = vpop.eup %1598  ;;  %1600 = vpow2.f32 %v1512_v39 }
 0xbef   :  { %v956_v59 = vadd.f32 1.0, %v1599_v58 }
 0xbf1   :  { %1602 = vrcp.f32 %v956_v59  ;;  %v968_v5 = vand.u32 2147483648, %v956_v59  ;;  %v966_v6 = vand.u32 2147483647, %v956_v59  ;;  %vm962_vm10 = vweird.f32 %v956_v59 }
 0xbf3   :  { %v969_v16 = vor.u32 1.1754944e-38, %v968_v5  ;;  %vm967_vm12 = vcmp.eq.f32.partialorder %v966_v6, 8.507059e+37 }
 0xbf4   :  { %v1601_v60 = vpop.eup %1600 }
 0xbf5   :  { %v893_v61 = vadd.f32 1.0, %v1601_v60 }
 0xbf7   :  { %v1603_v62 = vpop.eup %1602  ;;  %1604 = vrcp.f32 %v893_v61  ;;  %v905_v21 = vand.u32 2147483648, %v893_v61  ;;  %v903_v25 = vand.u32 2147483647, %v893_v61  ;;  %vm899_vm14 = vweird.f32 %v893_v61 }
 0xbf8   :  { %v958_v2 = vmul.f32 %v1603_v62, %v956_v59  ;;  %vm963_vm9 = vweird.f32 %v1603_v62 }
 0xbf9   :  { %vm964_vm11 = vmor %vm962_vm10, %vm963_vm9  ;;  %v906_v26 = vor.u32 1.1754944e-38, %v905_v21  ;;  %vm904_vm0 = vcmp.eq.f32.partialorder %v903_v25, 8.507059e+37 }
 0xbfa   :  { %v959_v4 = vsub.f32 1.0, %v958_v2 }
 0xbfb   :  { %v912_v10 = vpop.permute.xlu1 %911 }
 0xbfc   :  { %v960_v48 = vmul.f32 %v1603_v62, %v959_v4 }
 0xbfd   :  { %v1605_v9 = vpop.eup %1604 }
 0xbfe   :  { %v895_v12 = vmul.f32 %v1605_v9, %v893_v61  ;;  %v961_v14 = vadd.f32 %v1603_v62, %v960_v48  ;;  %vm900_vm13 = vweird.f32 %v1605_v9 }
 0xbff   :  { %vm901_vm15 = vmor %vm899_vm14, %vm900_vm13 }
 0xc00   :  { %v896_v19 = vsub.f32 1.0, %v895_v12  ;;  %v965_v20 = vsel %vm964_vm11, %v1603_v62, %v961_v14 }
 0xc01   :  { %v970_v22 = vsel %vm967_vm12, %v969_v16, %v965_v20 }
 0xc02   :  { %v897_v24 = vmul.f32 %v1605_v9, %v896_v19  ;;  %v993_v57 = vmul.f32 %v991_v17, %v970_v22  ;;  %v985_v1 = vsub.f32 1.0, %v970_v22 }
 0xc04   :  { %v898_v63 = vadd.f32 %v1605_v9, %v897_v24 }
 0xc06   :  { %v902_v27 = vsel %vm901_vm15, %v1605_v9, %v898_v63 }
 0xc07   :  { %v907_v11 = vsel %vm904_vm0, %v906_v26, %v902_v27 }
 0xc08   :  { %v914_v28 = vmul.f32 %v912_v10, %v907_v11  ;;  %v921_v23 = vsub.f32 1.0, %v907_v11  ;;  %v927_v47 = vmul.f32 %v907_v11, %v2105_v49 }
 0xc0a   :  { %916 = vrot.lane.b32.xlu0 %v914_v28, %s1751_s17 }
 0xc40   :  { %v976_v29 = vpop.permute.xlu2 %975 }
 0xc41   :  { %v978_v30 = vmul.f32 %v976_v29, %v970_v22 }
 0xc43   :  { %980 = vrot.lane.b32.xlu1 %v978_v30, %s1751_s17 }
 0xc7c   :  { %v917_v31 = vpop.permute.xlu0 %916 }
 0xc7d   :  { %v919_v35 = vadd.f32 %v917_v31, %v862_v7 }
 0xc7f   :  { %1606 = vtanh.f32 %v919_v35 }
 0xc85   :  { %v1607_v40 = vpop.eup %1606 }
 0xc86   :  { %923 = vrot.lane.b32.xlu2 %v1607_v40, %s1752_s4 }
 0xcb5   :  { %v981_v43 = vpop.permute.xlu1 %980 }
 0xcb6   :  { %v983_v13 = vadd.f32 %v981_v43, %v2097_v15 }
 0xcb8   :  { %1608 = vtanh.f32 %v983_v13 }
 0xcbe   :  { %v1609_v18 = vpop.eup %1608 }
 0xcbf   :  { %987 = vrot.lane.b32.xlu0 %v1609_v18, %s1752_s4 }
 0xce0   :  { %v924_v46 = vpop.permute.xlu2 %923 }
 0xce1   :  { %v926_v51 = vmul.f32 %v924_v46, %v921_v23 }
 0xce3   :  { %v2145_v52 = vadd.f32 %v927_v47, %v926_v51 }
 0xce5   :  { %1022 = vrot.lane.b32.xlu1 %v2145_v52, %s1752_s4 }
 0xd31   :  { %v988_v53 = vpop.permute.xlu0 %987 }
 0xd32   :  { %v990_v54 = vmul.f32 %v988_v53, %v985_v1 }
 0xd34   :  { %v2149_v55 = vadd.f32 %v993_v57, %v990_v54 }
 0xd36   :  { %v996_v32 = vrot.slane %v2149_v55, 2  ;;  %v1148_v47 = vrot.slane %v2149_v55, 6 }
 0xd38   :  { %997 = vrot.lane.b32.xlu2 %v996_v32, %s1752_s4 }
 0xd57   :  { %v1023_v44 = vpop.permute.xlu1 %1022 }
 0xd58   :  { %1516 = vmatmul.msk.f32.vlgmr.msra.gmra.mxu3 %vm143_vm2, %v1023_v44 }
 0xd92   :  { %v998_v37 = vpop.permute.xlu2 %997 }
 0xd93   :  { %1515 = vmatmul.msk.f32.vlgmr.msra.gmra.mxu2 %vm143_vm2, %v998_v37  ;;  %1518 = vmatmul.msk.f32.vlgmr.msra.gmra.mxu0 %vm143_vm2, %v998_v37 }
 0xddb   :  { %v1043_v49 = vpop.f32.mrf.mxu3 }
 0xddc   :  { %v1066_v0 = vadd.f32 %v1043_v49, %v1965_v50 }
 0xdde   :  { %1068 = vrot.lane.b32.xlu0 %v1066_v0, %s1751_s17 }
 0xe10   :  { %v1103_v33 = vpop.f32.mrf.mxu0 }
 0xe11   :  { %v1129_v38 = vadd.f32 %v1103_v33, %v1880_v8  ;;  %v1107_v9 = vrot.slane %v1103_v33, 4  ;;  %v2185_v33 = vld [vmem:[%s2242_s8] ss:$0 sm:$0xff] }
 0xe13   :  { %v1131_v41 = vrot.slane %v1129_v38, 4  ;;  %v1109_v12 = vadd.f32 %v1107_v9, %v2097_v15 }
 0xe15   :  { %1132 = vrot.lane.b32.xlu1 %v1131_v41, %s1751_s17  ;;  %v1519_v14 = vmul.f32 -1.442695, %v1109_v12 }
 0xe16   :  { %v1018_v42 = vpop.f32.mrf.mxu2 }
 0xe17   :  { %v1019_v34 = vadd.f32 %v1973_v56, %v1018_v42 }
 0xe19   :  { %v1046_v45 = vadd.f32 %v1043_v49, %v1019_v34 }
 0xe1b   :  { %v1517_v3 = vmul.f32 -1.442695, %v1046_v45 }
 0xe1d   :  { %1610 = vpow2.f32 %v1517_v3 }
 0xe23   :  { %v1611_v7 = vpop.eup %1610 }
 0xe24   :  { %v1050_v36 = vadd.f32 1.0, %v1611_v7 }
 0xe26   :  { %1612 = vrcp.f32 %v1050_v36  ;;  %v1062_v62 = vand.u32 2147483648, %v1050_v36  ;;  %vm1056_vm3 = vweird.f32 %v1050_v36  ;;  %v1060_v2 = vand.u32 2147483647, %v1050_v36 }
 0xe27   :  { %1614 = vpow2.f32 %v1519_v14 }
 0xe28   :  { %v1063_v5 = vor.u32 1.1754944e-38, %v1062_v62  ;;  %vm1061_vm5 = vcmp.eq.f32.partialorder %v1060_v2, 8.507059e+37 }
 0xe2c   :  { %v1613_v39 = vpop.eup %1612 }
 0xe2d   :  { %v1052_v58 = vmul.f32 %v1613_v39, %v1050_v36  ;;  %vm1057_vm1 = vweird.f32 %v1613_v39  ;;  %v1615_v16 = vpop.eup %1614 }
 0xe2e   :  { %vm1058_vm4 = vmor %vm1056_vm3, %vm1057_vm1  ;;  %v1113_v17 = vadd.f32 1.0, %v1615_v16 }
 0xe2f   :  { %v1053_v59 = vsub.f32 1.0, %v1052_v58 }
 0xe30   :  { %1616 = vrcp.f32 %v1113_v17  ;;  %v1125_v25 = vand.u32 2147483648, %v1113_v17  ;;  %vm1119_vm7 = vweird.f32 %v1113_v17  ;;  %v1123_v57 = vand.u32 2147483647, %v1113_v17 }
 0xe31   :  { %v1054_v60 = vmul.f32 %v1613_v39, %v1053_v59 }
 0xe32   :  { %v1126_v26 = vor.u32 1.1754944e-38, %v1125_v25  ;;  %vm1124_vm9 = vcmp.eq.f32.partialorder %v1123_v57, 8.507059e+37 }
 0xe33   :  { %v1055_v61 = vadd.f32 %v1613_v39, %v1054_v60 }
 0xe35   :  { %v1059_v4 = vsel %vm1058_vm4, %v1613_v39, %v1055_v61 }
 0xe36   :  { %v1064_v48 = vsel %vm1061_vm5, %v1063_v5, %v1059_v4  ;;  %v1617_v19 = vpop.eup %1616 }
 0xe37   :  { %v1115_v20 = vmul.f32 %v1617_v19, %v1113_v17  ;;  %vm1120_vm6 = vweird.f32 %v1617_v19  ;;  %v1078_v43 = vsub.f32 1.0, %v1064_v48  ;;  %v1084_v18 = vmul.f32 %v1064_v48, %v2145_v52 }
 0xe38   :  { %vm1121_vm8 = vmor %vm1119_vm7, %vm1120_vm6  ;;  %vm1403_vm7 = vcmask 261126  }
 0xe39   :  { %v1116_v21 = vsub.f32 1.0, %v1115_v20 }
 0xe3b   :  { %v1117_v22 = vmul.f32 %v1617_v19, %v1116_v21 }
 0xe3d   :  { %v1118_v24 = vadd.f32 %v1617_v19, %v1117_v22 }
 0xe3f   :  { %v1122_v63 = vsel %vm1121_vm8, %v1617_v19, %v1118_v24  ;;  %vm1410_vm8 = vcmask 254976  }
 0xe40   :  { %v1127_v27 = vsel %vm1124_vm9, %v1126_v26, %v1122_v63 }
 0xe41   :  { %v1142_v51 = vsub.f32 1.0, %v1127_v27  ;;  %v1150_v53 = vmul.f32 %v1148_v47, %v1127_v27 }
 0xe50   :  { %v1069_v56 = vpop.permute.xlu0 %1068 }
 0xe51   :  { %v1071_v6 = vmul.f32 %v1069_v56, %v1064_v48 }
 0xe53   :  { %1073 = vrot.lane.b32.xlu2 %v1071_v6, %s1751_s17 }
 0xe87   :  { %v1133_v11 = vpop.permute.xlu1 %1132 }
 0xe88   :  { %v1135_v10 = vmul.f32 %v1133_v11, %v1127_v27 }
 0xe8a   :  { %1137 = vrot.lane.b32.xlu0 %v1135_v10, %s1751_s17 }
 0xead   :  { %v1074_v28 = vpop.permute.xlu2 %1073 }
 0xeae   :  { %v1076_v29 = vadd.f32 %v1074_v28, %v1019_v34 }
 0xeb0   :  { %1618 = vtanh.f32 %v1076_v29 }
 0xeb6   :  { %v1619_v30 = vpop.eup %1618 }
 0xeb7   :  { %1080 = vrot.lane.b32.xlu1 %v1619_v30, %s1752_s4 }
 0xefc   :  { %v1138_v31 = vpop.permute.xlu0 %1137 }
 0xefd   :  { %v1140_v35 = vadd.f32 %v1138_v31, %v2097_v15 }
 0xeff   :  { %1620 = vtanh.f32 %v1140_v35 }
 0xf05   :  { %v1621_v40 = vpop.eup %1620 }
 0xf06   :  { %1144 = vrot.lane.b32.xlu2 %v1621_v40, %s1752_s4 }
 0xf29   :  { %v1081_v13 = vpop.permute.xlu1 %1080 }
 0xf2a   :  { %v1083_v23 = vmul.f32 %v1081_v13, %v1078_v43 }
 0xf2c   :  { %v2168_v46 = vadd.f32 %v1084_v18, %v1083_v23 }
 0xf2e   :  { %1179 = vrot.lane.b32.xlu0 %v2168_v46, %s1752_s4 }
 0xf60   :  { %v1145_v1 = vpop.permute.xlu2 %1144 }
 0xf61   :  { %v1147_v54 = vmul.f32 %v1145_v1, %v1142_v51 }
 0xf63   :  { %v2173_v32 = vadd.f32 %v1150_v53, %v1147_v54 }
 0xf65   :  { %v1153_v44 = vrot.slane %v2173_v32, 4  ;;  %v1305_v47 = vrot.slane %v2173_v32, 6 }
 0xf67   :  { %1154 = vrot.lane.b32.xlu1 %v1153_v44, %s1752_s4 }
 0xfa0   :  { %v1180_v37 = vpop.permute.xlu0 %1179 }
 0xfa1   :  { %1521 = vmatmul.msk.f32.vlgmr.msrb.gmra.mxu2 %vm143_vm2, %v1180_v37 }
 0xfd9   :  { %v1155_v52 = vpop.permute.xlu1 %1154 }
 0xfda   :  { %1520 = vmatmul.msk.f32.vlgmr.msrb.gmra.mxu1 %vm143_vm2, %v1155_v52  ;;  %1523 = vmatmul.msk.f32.vlgmr.msrb.gmra.mxu3 %vm143_vm2, %v1155_v52 }
0x1024   :  { %v1200_v49 = vpop.f32.mrf.mxu2 }
0x1025   :  { %v1223_v55 = vadd.f32 %v1200_v49, %v1965_v50 }
0x1027   :  { %1225 = vrot.lane.b32.xlu2 %v1223_v55, %s1751_s17 }
0x1057   :  { %v1175_v0 = vpop.f32.mrf.mxu1 }
0x1058   :  { %v1176_v38 = vadd.f32 %v2185_v33, %v1175_v0 }
0x105a   :  { %v1203_v41 = vadd.f32 %v1200_v49, %v1176_v38 }
0x105c   :  { %v1522_v42 = vmul.f32 -1.442695, %v1203_v41 }
0x105d   :  { %v1260_v34 = vpop.f32.mrf.mxu3 }
0x105e   :  { %1622 = vpow2.f32 %v1522_v42  ;;  %v1286_v45 = vadd.f32 %v1260_v34, %v1880_v8  ;;  %v1264_v6 = vrot.slane %v1260_v34, 2 }
0x1060   :  { %v1288_v3 = vrot.slane %v1286_v45, 2  ;;  %v1266_v9 = vadd.f32 %v1264_v6, %v2097_v15 }
0x1062   :  { %1289 = vrot.lane.b32.xlu0 %v1288_v3, %s1751_s17  ;;  %v1524_v12 = vmul.f32 -1.442695, %v1266_v9 }
0x1064   :  { %v1623_v7 = vpop.eup %1622 }
0x1065   :  { %v1207_v36 = vadd.f32 1.0, %v1623_v7 }
0x1067   :  { %1624 = vrcp.f32 %v1207_v36  ;;  %v1219_v62 = vand.u32 2147483648, %v1207_v36  ;;  %vm1213_vm11 = vweird.f32 %v1207_v36  ;;  %v1217_v2 = vand.u32 2147483647, %v1207_v36 }
0x1068   :  { %1626 = vpow2.f32 %v1524_v12 }
0x1069   :  { %v1220_v5 = vor.u32 1.1754944e-38, %v1219_v62  ;;  %vm1218_vm13 = vcmp.eq.f32.partialorder %v1217_v2, 8.507059e+37 }
0x106d   :  { %v1625_v39 = vpop.eup %1624 }
0x106e   :  { %v1209_v58 = vmul.f32 %v1625_v39, %v1207_v36  ;;  %vm1214_vm10 = vweird.f32 %v1625_v39  ;;  %v1627_v14 = vpop.eup %1626 }
0x106f   :  { %vm1215_vm12 = vmor %vm1213_vm11, %vm1214_vm10  ;;  %v1270_v16 = vadd.f32 1.0, %v1627_v14 }
0x1070   :  { %v1210_v59 = vsub.f32 1.0, %v1209_v58 }
0x1071   :  { %1628 = vrcp.f32 %v1270_v16  ;;  %v1282_v24 = vand.u32 2147483648, %v1270_v16  ;;  %vm1276_vm15 = vweird.f32 %v1270_v16  ;;  %v1280_v25 = vand.u32 2147483647, %v1270_v16 }
0x1072   :  { %v1211_v60 = vmul.f32 %v1625_v39, %v1210_v59 }
0x1073   :  { %v1283_v63 = vor.u32 1.1754944e-38, %v1282_v24  ;;  %vm1281_vm1 = vcmp.eq.f32.partialorder %v1280_v25, 8.507059e+37 }
0x1074   :  { %v1212_v61 = vadd.f32 %v1625_v39, %v1211_v60 }
0x1076   :  { %v1216_v4 = vsel %vm1215_vm12, %v1625_v39, %v1212_v61 }
0x1077   :  { %v1221_v56 = vsel %vm1218_vm13, %v1220_v5, %v1216_v4  ;;  %v1629_v17 = vpop.eup %1628 }
0x1078   :  { %v1272_v19 = vmul.f32 %v1629_v17, %v1270_v16  ;;  %vm1277_vm14 = vweird.f32 %v1629_v17  ;;  %v1235_v40 = vsub.f32 1.0, %v1221_v56  ;;  %v1241_v13 = vmul.f32 %v1221_v56, %v2168_v46 }
0x1079   :  { %vm1278_vm0 = vmor %vm1276_vm15, %vm1277_vm14 }
0x107a   :  { %v1273_v20 = vsub.f32 1.0, %v1272_v19  ;;  %v1413_v19 = vld [vmem:[%s2244_s10] sm:$0xff] }
0x107c   :  { %v1274_v21 = vmul.f32 %v1629_v17, %v1273_v20 }
0x107e   :  { %v1275_v22 = vadd.f32 %v1629_v17, %v1274_v21 }
0x1080   :  { %v1279_v57 = vsel %vm1278_vm0, %v1629_v17, %v1275_v22  ;;  %v1543_v22 = vld [vmem:[%s2245_s11] ss:$0 sm:$0xff] }
0x1081   :  { %v1226_v8 = vpop.permute.xlu2 %1225  ;;  %v1284_v27 = vsel %vm1281_vm1, %v1283_v63, %v1279_v57 }
0x1082   :  { %v1228_v48 = vmul.f32 %v1226_v8, %v1221_v56  ;;  %v1299_v51 = vsub.f32 1.0, %v1284_v27  ;;  %v1307_v53 = vmul.f32 %v1305_v47, %v1284_v27  ;;  %v1416_v8 = vld [vmem:[%s2244_s10 + $0x18] sm:$0xff]  ;;  %v1415_v56 = vld [vmem:[%s2244_s10 + $0x10] sm:$0xff] }
0x1083   :  { %1438 = vmatpush.msra.mxu2 %v1416_v8 }
0x1084   :  { %1230 = vrot.lane.b32.xlu1 %v1228_v48, %s1751_s17  ;;  %v1414_v48 = vld [vmem:[%s2244_s10 + $0x8] sm:$0xff] }
0x1085   :  { %1439 = vmatpush.msra.mxu2 %v1415_v56 }
0x1087   :  { %1440 = vmatpush.msra.mxu2 %v1414_v48 }
0x1089   :  { %1441 = vmatpush.msra.mxu2 %v1413_v19 }
0x10d4   :  { %v1290_v26 = vpop.permute.xlu0 %1289 }
0x10d5   :  { %v1292_v11 = vmul.f32 %v1290_v26, %v1284_v27 }
0x10d7   :  { %1294 = vrot.lane.b32.xlu2 %v1292_v11, %s1751_s17 }
0x10f6   :  { %v1231_v10 = vpop.permute.xlu1 %1230 }
0x10f7   :  { %v1233_v28 = vadd.f32 %v1231_v10, %v1176_v38 }
0x10f9   :  { %1630 = vtanh.f32 %v1233_v28 }
0x10ff   :  { %v1631_v29 = vpop.eup %1630 }
0x1100   :  { %1237 = vrot.lane.b32.xlu0 %v1631_v29, %s1752_s4 }
0x1131   :  { %v1295_v30 = vpop.permute.xlu2 %1294 }
0x1132   :  { %v1297_v31 = vadd.f32 %v1295_v30, %v2097_v15 }
0x1134   :  { %1632 = vtanh.f32 %v1297_v31 }
0x113a   :  { %v1633_v35 = vpop.eup %1632 }
0x113b   :  { %1301 = vrot.lane.b32.xlu1 %v1633_v35, %s1752_s4 }
0x1172   :  { %v1238_v43 = vpop.permute.xlu0 %1237 }
0x1173   :  { %v1240_v18 = vmul.f32 %v1238_v43, %v1235_v40 }
0x1175   :  { %v1242_v23 = vadd.f32 %v1241_v13, %v1240_v18 }
0x1177   :  { %1336 = vrot.lane.b32.xlu2 %v1242_v23, %s1752_s4 }
0x11ad   :  { %v1302_v1 = vpop.permute.xlu1 %1301 }
0x11ae   :  { %v1304_v54 = vmul.f32 %v1302_v1, %v1299_v51 }
0x11b0   :  { %v1308_v44 = vadd.f32 %v1307_v53, %v1304_v54 }
0x11b2   :  { %v1310_v15 = vrot.slane %v1308_v44, 6 }
0x11b4   :  { %1311 = vrot.lane.b32.xlu0 %v1310_v15, %s1752_s4 }
0x11d1   :  { %v1337_v37 = vpop.permute.xlu2 %1336 }
0x11d2   :  { %1526 = vmatmul.msk.f32.vlgmr.msra.gmra.mxu1 %vm143_vm2, %v1337_v37 }
0x1226   :  { %v1312_v52 = vpop.permute.xlu0 %1311 }
0x1227   :  { %1525 = vmatmul.msk.f32.vlgmr.msrb.gmra.mxu0 %vm143_vm2, %v1312_v52 }
0x124f   :  { %v1357_v46 = vpop.f32.mrf.mxu1 }
0x1250   :  { %v1380_v49 = vadd.f32 %v1357_v46, %v1965_v50 }
0x1252   :  { %1382 = vrot.lane.b32.xlu1 %v1380_v49, %s1751_s17 }
0x12a4   :  { %v1332_v32 = vpop.f32.mrf.mxu0 }
0x12a5   :  { %v1333_v55 = vadd.f32 %v2185_v33, %v1332_v32 }
0x12a7   :  { %v1360_v0 = vadd.f32 %v1357_v46, %v1333_v55 }
0x12a9   :  { %v1527_v38 = vmul.f32 -1.442695, %v1360_v0 }
0x12ab   :  { %1634 = vpow2.f32 %v1527_v38 }
0x12b1   :  { %v1635_v41 = vpop.eup %1634 }
0x12b2   :  { %v1364_v42 = vadd.f32 1.0, %v1635_v41 }
0x12b4   :  { %1636 = vrcp.f32 %v1364_v42  ;;  %v1376_v7 = vand.u32 2147483648, %v1364_v42  ;;  %v1374_v39 = vand.u32 2147483647, %v1364_v42  ;;  %vm1370_vm4 = vweird.f32 %v1364_v42 }
0x12b6   :  { %v1377_v50 = vor.u32 1.1754944e-38, %v1376_v7  ;;  %vm1375_vm6 = vcmp.eq.f32.partialorder %v1374_v39, 8.507059e+37 }
0x12ba   :  { %v1637_v34 = vpop.eup %1636 }
0x12bb   :  { %v1366_v45 = vmul.f32 %v1637_v34, %v1364_v42  ;;  %vm1371_vm3 = vweird.f32 %v1637_v34 }
0x12bc   :  { %vm1372_vm5 = vmor %vm1370_vm4, %vm1371_vm3 }
0x12bd   :  { %v1367_v3 = vsub.f32 1.0, %v1366_v45 }
0x12bf   :  { %v1368_v36 = vmul.f32 %v1637_v34, %v1367_v3 }
0x12c1   :  { %v1369_v58 = vadd.f32 %v1637_v34, %v1368_v36 }
0x12c3   :  { %v1373_v59 = vsel %vm1372_vm5, %v1637_v34, %v1369_v58 }
0x12c4   :  { %v1378_v33 = vsel %vm1375_vm6, %v1377_v50, %v1373_v59  ;;  %v1383_v60 = vpop.permute.xlu1 %1382 }
0x12c5   :  { %v1385_v61 = vmul.f32 %v1383_v60, %v1378_v33  ;;  %v1392_v6 = vsub.f32 1.0, %v1378_v33  ;;  %v1398_v12 = vmul.f32 %v1378_v33, %v1242_v23 }
0x12c7   :  { %1387 = vrot.lane.b32.xlu2 %v1385_v61, %s1751_s17 }
0x12cf   :  { %1400 = vrot.lane.b32.xlu2 %v1308_v44, %s1752_s4 }
0x1321   :  { %v1388_v62 = vpop.permute.xlu2 %1387 }
0x1322   :  { %v1390_v2 = vadd.f32 %v1388_v62, %v1333_v55 }
0x1324   :  { %1638 = vtanh.f32 %v1390_v2 }
0x1329   :  { %v1401_v4 = vpop.permute.xlu2 %1400 }
0x132a   :  { %v1639_v5 = vpop.eup %1638  ;;  %1404 = vst.msk [vmem:[#allocation8 - $0x6] sm:$0xc0] %vm1403_vm7, %v1401_v4 }
0x132b   :  { %1394 = vrot.lane.b32.xlu0 %v1639_v5, %s1752_s4 }
0x139d   :  { %v1395_v9 = vpop.permute.xlu0 %1394 }
0x139e   :  { %v1397_v14 = vmul.f32 %v1395_v9, %v1392_v6 }
0x13a0   :  { %v1399_v16 = vadd.f32 %v1398_v12, %v1397_v14 }
0x13a2   :  { %1406 = vrot.lane.b32.xlu0 %v1399_v16, %s1752_s4  ;;  %v1412_v17 = vmax.f32 %v1399_v16, 0.0 }
0x13a4   :  { %1422 = vrot.lane.b32.xlu1 %v1412_v17, %s1752_s4  ;;  %s1754_s4 = smov 2  }
0x1414   :  { %v1407_v20 = vpop.permute.xlu0 %1406 }
0x1415   :  { %1411 = vst.msk [vmem:[#allocation8 + $0x2] sm:$0x3] %vm1410_vm8, %v1407_v20 }
0x1416   :  { %v1423_v21 = vpop.permute.xlu1 %1422  ;;  %1471 = dma.vmem_to_hbm [thread:$0]  %s1464_s16, 64, %s1466_s18, [#allocation9], %s1750_s14, %s1750_s14, %s1754_s4  }
0x1417   :  { %1528 = vmatmul.msk.f32.vlgmr.msra.gmra.mxu2 %vm143_vm2, %v1423_v21  ;;  %vm1446_vm2 = vcmask 58368  }
0x149a   :  { %v1443_v24 = vpop.f32.mrf.mxu2 }
0x149b   :  { %v1444_v25 = vadd.f32 %v1543_v22, %v1443_v24 }
0x149d   :  { %1447 = vst.msk [vmem:[#allocation7] sm:$0x3] %vm1446_vm2, %v1444_v25 }
0x149e   :  { %1458 = dma.vmem_to_hbm [thread:$0]  %s1454_s20, 32, %s1456_s7, [#allocation4]  }
0x149f   :  { %1742 = dma.done.wait [#allocation4], 32  }
0x14a0   :  { %1743 = vsyncadd [#allocation4], 4294967264 }
0x14a1   :  { %1744 = dma.done.wait [#allocation9], 64  }
0x14a2   :  { %1745 = vsyncadd [#allocation9], 4294967232 }
0x14a3   :  { %1480 = vsyncpa [#allocation3], 1 }
0x14a4   :  { %1481 = vsyncpa [#allocation6], 1 }
0x14a5   :  { %1482 = vsyncpa [#allocation4], 1 }
0x14a6   :  { %1483 = vsyncpa [#allocation9], 1 }

</bundles_post_ra>
